<compile_context>
chip_gen: v7x
topology: tpu7x:2x2x1
jax: 0.10.0
libtpu: 0.0.40
codegen_flags: <defaults>
</compile_context>

<pallas_src>
import functools

import jax
import jax.numpy as jnp
from jax import lax
from jax.experimental import pallas as pl
from jax.experimental.pallas import tpu as pltpu

NEG_SLOPE = 0.01   # nn.LeakyReLU default
BN_EPS = 1e-5


# --------------------------------------------------------------------------- #
# VMEM budgeting helpers
# --------------------------------------------------------------------------- #
def _round_up(x, m):
    return ((x + m - 1) // m) * m


def _tile_bytes(shape, dtype):
    """VMEM bytes of one tile of `shape`, including (sublane, lane) padding:
    minor dim rounds up to 128 lanes, second-minor to 8*(4//itemsize) sublanes
    (8 for f32, 16 for bf16)."""
    itemsize = jnp.dtype(dtype).itemsize
    shape = (1, 1) + tuple(int(d) for d in shape)
    lead = 1
    for d in shape[:-2]:
        lead *= d
    sub = _round_up(shape[-2], 8 * (4 // itemsize))
    lane = _round_up(shape[-1], 128)
    return lead * sub * lane * itemsize


def _per_elem_vmem_bytes(hh, wh, cin, cout):
    """Per-batch-element VMEM footprint of one grid step (padded-tile bytes)."""
    s = hh * wh
    bf16, f32 = jnp.bfloat16, jnp.float32
    io = (2 * _tile_bytes((4 * hh, wh, cin), bf16)       # input block (double-buffered)
          + 2 * _tile_bytes((cout, s), f32))             # output block (double-buffered)
    work = (_tile_bytes((hh, wh, cin), bf16)             # pooled
            + 2 * _tile_bytes((s, 9 * cin), bf16)        # conv1 im2col (+ reshape copy)
            + _tile_bytes((s, cout), f32)                 # h1 (f32)
            + _tile_bytes((hh, wh, cout), bf16)           # h1 (bf16)
            + 2 * _tile_bytes((s, 9 * cout), bf16)        # conv2 im2col (+ reshape copy)
            + 2 * _tile_bytes((s, cout), f32))            # h2 (+ transposed copy)
    return int(1.5 * (io + work))                         # compiler-temporary slack


def _vmem_limit_bytes():
    """Generation-aware VMEM request: ~3/4 of physical (headroom for compiler
    internal scratch), capped at 100 MiB.  v5e/v6e: 128 MiB -> ~96 MiB request;
    v7x: 64 MiB -> 48 MiB request."""
    try:
        cap = int(pltpu.get_tpu_info().vmem_capacity_bytes)
    except Exception:
        cap = 64 * 1024 * 1024     # conservative fallback (v7x-sized)
    return min(cap * 3 // 4, 100 * 1024 * 1024)


def _pick_bb(batch, per_elem_bytes, budget_bytes):
    """Batch elements per grid step.  Largest bb inside the VMEM budget while
    keeping enough grid steps for pipelining / v7x cross-TC sharding (prefer
    >= 4 steps, then >= 2).  Prefers exact divisors of `batch` (no padding);
    otherwise the caller pads the batch up to a multiple of bb."""
    bb_max = max(1, min(batch, budget_bytes // max(per_elem_bytes, 1)))
    steps = lambda d: -(-batch // d)
    for min_steps in (4, 2, 1):
        divs = [d for d in range(1, bb_max + 1)
                if batch % d == 0 and steps(d) >= min_steps]
        if divs:
            return max(divs)
        cands = [d for d in range(1, bb_max + 1) if steps(d) >= min_steps]
        if cands:
            return max(cands)
    return 1


# --------------------------------------------------------------------------- #
# pltpu.roll convention self-test (cached) -- replaces the previous "compare
# the whole kernel against the reference at call time" selection.
# --------------------------------------------------------------------------- #
@functools.lru_cache(maxsize=None)
def _roll_supported(wh, c):
    """Does pltpu.roll compile for a (.., wh, c) bf16 operand on this
    jax/libtpu build AND follow jnp.roll's convention along the second-minor
    axis?  Tiny kernel, result cached per (wh, c)."""
    shape = (1, 8, wh, c)
    n = 8 * wh * c
    x = (jnp.arange(n, dtype=jnp.float32) % 53.0).reshape(shape).astype(jnp.bfloat16)

    def k(x_ref, o_ref):
        o_ref[...] = pltpu.roll(x_ref[...], shift=1, axis=2)

    try:
        y = pl.pallas_call(k, out_shape=jax.ShapeDtypeStruct(shape, jnp.bfloat16))(x)
        return bool(jnp.array_equal(y, jnp.roll(x, 1, axis=2)))
    except Exception:
        return False


# --------------------------------------------------------------------------- #
# Kernel
# --------------------------------------------------------------------------- #
def _im2col_taps(x, hh, wh, use_xlu_roll):
    """3x3 im2col operand for a conv with circular padding along W and zero
    padding along H.

    x: (bb, hh, wh, C) bf16.  Returns (bb, hh, wh, 9*C) bf16 with the K axis
    ordered (dh, dw, c): out[..., (dh*3+dw)*C + c] = x_pad[h+dh-1, (w+dw-1)%wh, c].
    """
    bb, _, _, c = x.shape
    zrow = jnp.zeros((bb, 1, wh, c), dtype=x.dtype)

    def shift_h(v, dh):                    # zero-padded shift along H (major axis)
        if dh == 0:                        # needs x[h-1]
            return jnp.concatenate([zrow, v[:, :hh - 1]], axis=1)
        if dh == 2:                        # needs x[h+1]
            return jnp.concatenate([v[:, 1:], zrow], axis=1)
        return v

    def shift_w(v, dw):                    # circular shift along W (sublane axis)
        if dw == 1:
            return v
        delta = 1 if dw == 0 else wh - 1   # tap[w] = v[(w + dw - 1) % wh]
        if use_xlu_roll:
            # XLU rotation: runs off the VPU/MXU critical slots.
            return pltpu.roll(v, shift=delta, axis=2)
        # concatenate-based rotation (portable fallback, same convention)
        return jnp.concatenate([v[:, :, wh - delta:], v[:, :, :wh - delta]], axis=2)

    taps = []
    for dh in range(3):
        vh = shift_h(x, dh)
        for dw in range(3):
            taps.append(shift_w(vh, dw))
    return jnp.concatenate(taps, axis=3)   # K assembled on the lane axis


def _down_kernel(x_ref, w1_ref, s1_ref, b1_ref, w2_ref, s2_ref, b2_ref, o_ref,
                 *, bb, hh, wh, use_xlu_roll, nhwc_out):
    cin = x_ref.shape[-1]
    cout = w1_ref.shape[-1]
    s = hh * wh

    # ---- fused MaxPool2d(2): max over the four pre-split window positions ----
    # bf16 max == f32 max followed by bf16 rounding (rounding is monotone).
    x = x_ref[...]                                        # (bb, 4*hh, wh, cin) bf16
    pooled = jnp.maximum(
        jnp.maximum(x[:, 0 * hh:1 * hh], x[:, 1 * hh:2 * hh]),
        jnp.maximum(x[:, 2 * hh:3 * hh], x[:, 3 * hh:4 * hh]))   # (bb, hh, wh, cin)

    # ---- conv1: one im2col matmul, M = bb*s, K = 9*cin (bf16 -> f32 acc) -----
    x9 = _im2col_taps(pooled, hh, wh, use_xlu_roll)       # (bb, hh, wh, 9*cin) bf16
    h1 = jnp.dot(x9.reshape(bb * s, 9 * cin), w1_ref[...],
                 preferred_element_type=jnp.float32)      # (bb*s, cout) f32
    h1 = h1 * s1_ref[...] + b1_ref[...]                   # folded BN (+ conv bias)
    h1 = jnp.maximum(h1, NEG_SLOPE * h1)                  # LeakyReLU (f32 VPU)

    # ---- conv2: same orientation, one big-M matmul ----------------------------
    h1b = h1.astype(jnp.bfloat16).reshape(bb, hh, wh, cout)
    x9b = _im2col_taps(h1b, hh, wh, use_xlu_roll)         # (bb, hh, wh, 9*cout) bf16
    h2 = jnp.dot(x9b.reshape(bb * s, 9 * cout), w2_ref[...],
                 preferred_element_type=jnp.float32)      # (bb*s, cout) f32
    h2 = h2 * s2_ref[...] + b2_ref[...]                   # folded BN (+ conv bias)
    h2 = jnp.maximum(h2, NEG_SLOPE * h2)                  # LeakyReLU (f32 VPU)

    h2 = h2.reshape(bb, s, cout)
    if nhwc_out:
        o_ref[...] = h2.astype(o_ref.dtype)               # lane-dense on cout
    else:
        # small XLU swap -> channel-major (NCHW-flat) store; no wrapper-side
        # output transpose pass is needed.
        o_ref[...] = jnp.swapaxes(h2, 1, 2).astype(o_ref.dtype)


# --------------------------------------------------------------------------- #
# Wrapper
# --------------------------------------------------------------------------- #
def down_forward(x_nchw, w1, cb1, g1, be1, m1, v1, w2, cb2, g2, be2, m2, v2):
    """Forward of `down` (eval mode): (B, Cin, H, W) f32 -> (B, Cout, H/2, W/2) f32."""
    B, Cin, H, W = x_nchw.shape
    Cout = w1.shape[0]
    Hh, Wh = H // 2, W // 2
    S = Hh * Wh

    # De-interleave the four 2x2 pool positions onto a non-minor row axis, done
    # in bf16 (halves this pre-pass's HBM traffic; conv operands are bf16
    # anyway and max() commutes with the monotone bf16 rounding).
    # TODO(synk): replace with four strided in_specs to drop this pre-pass.
    x = x_nchw.astype(jnp.bfloat16).reshape(B, Cin, Hh, 2, Wh, 2)
    xs = jnp.transpose(x, (0, 3, 5, 2, 4, 1)).reshape(B, 4 * Hh, Wh, Cin)

    def fold_bn(gamma, beta, mean, var, conv_bias):
        scale = (gamma / jnp.sqrt(var + BN_EPS)).astype(jnp.float32)
        bias = (beta + scale * (conv_bias - mean)).astype(jnp.float32)
        return scale.reshape(1, Cout), bias.reshape(1, Cout)

    s1, b1 = fold_bn(g1, be1, m1, v1, cb1)
    s2, b2 = fold_bn(g2, be2, m2, v2, cb2)

    # im2col weights, K-major (K = 9*C, tap-major then channel), bf16 for MXU.
    w1m = jnp.transpose(w1, (2, 3, 1, 0)).reshape(9 * Cin, Cout).astype(jnp.bfloat16)
    w2m = jnp.transpose(w2, (2, 3, 1, 0)).reshape(9 * Cout, Cout).astype(jnp.bfloat16)

    # Generation-aware VMEM request and consistent bb pick budget.
    vmem_limit = _vmem_limit_bytes()
    weight_bytes = 2 * (_tile_bytes((9 * Cin, Cout), jnp.bfloat16)
                        + _tile_bytes((9 * Cout, Cout), jnp.bfloat16)
                        + 4 * _tile_bytes((1, Cout), jnp.float32))
    budget = max(0, int(0.9 * vmem_limit) - weight_bytes)
    bb = _pick_bb(B, _per_elem_vmem_bytes(Hh, Wh, Cin, Cout), budget)

    n_steps = -(-B // bb)
    B_pad = n_steps * bb
    if B_pad != B:                           # remainder block -> pad the batch
        xs = jnp.pad(xs, ((0, B_pad - B), (0, 0), (0, 0), (0, 0)))

    use_roll = _roll_supported(Wh, Cin) and _roll_supported(Wh, Cout)
    nhwc_out = Cout >= 128                   # lane-dense store on the channel axis
    # TODO(synk): optional bf16 output dtype for v5e mem-bound configs.

    kernel = functools.partial(_down_kernel, bb=bb, hh=Hh, wh=Wh,
                               use_xlu_roll=use_roll, nhwc_out=nhwc_out)

    out_block = (bb, S, Cout) if nhwc_out else (bb, Cout, S)
    out_shape = jax.ShapeDtypeStruct((B_pad,) + out_block[1:], jnp.float32)

    out = pl.pallas_call(
        kernel,
        out_shape=out_shape,
        grid_spec=pltpu.PrefetchScalarGridSpec(
            num_scalar_prefetch=0,
            grid=(n_steps,),
            in_specs=[
                pl.BlockSpec((bb, 4 * Hh, Wh, Cin), lambda i: (i, 0, 0, 0)),
                pl.BlockSpec((9 * Cin, Cout), lambda i: (0, 0)),
                pl.BlockSpec((1, Cout), lambda i: (0, 0)),
                pl.BlockSpec((1, Cout), lambda i: (0, 0)),
                pl.BlockSpec((9 * Cout, Cout), lambda i: (0, 0)),
                pl.BlockSpec((1, Cout), lambda i: (0, 0)),
                pl.BlockSpec((1, Cout), lambda i: (0, 0)),
            ],
            out_specs=pl.BlockSpec(out_block, lambda i: (i, 0, 0)),
        ),
        compiler_params=pltpu.CompilerParams(
            # each step writes a distinct output block -> safe to shard the
            # batch axis across v7x's two TensorCores; neutral on v5e/v6e.
            dimension_semantics=("parallel",),
            vmem_limit_bytes=vmem_limit,
        ),
    )(xs, w1m, s1, b1, w2m, s2, b2)

    out = out[:B]
    if nhwc_out:
        return jnp.transpose(out.reshape(B, Hh, Wh, Cout), (0, 3, 1, 2))
    return out.reshape(B, Cout, Hh, Wh)      # metadata-only (already NCHW-flat)


# --------------------------------------------------------------------------- #
# Pure-JAX reference (eval mode), NCHW — used only for validation.
# --------------------------------------------------------------------------- #
def reference_forward(x, w1, cb1, g1, be1, m1, v1, w2, cb2, g2, be2, m2, v2):
    B, C, H, W = x.shape
    xp = x.reshape(B, C, H // 2, 2, W // 2, 2).max(axis=(3, 5))

    def block(h, w, cb, g, be, m, v):
        h = jnp.pad(h, ((0, 0), (0, 0), (0, 0), (1, 1)), mode="wrap")
        y = lax.conv_general_dilated(h, w, (1, 1), ((1, 1), (0, 0)),
                                     dimension_numbers=("NCHW", "OIHW", "NCHW"))
        y = y + cb[None, :, None, None]
        y = ((y - m[None, :, None, None])
             / jnp.sqrt(v[None, :, None, None] + BN_EPS)
             * g[None, :, None, None] + be[None, :, None, None])
        return jnp.where(y > 0, y, NEG_SLOPE * y)

    h = block(xp, w1, cb1, g1, be1, m1, v1)
    h = block(h, w2, cb2, g2, be2, m2, v2)
    return h


if __name__ == "__main__":
    B, Cin, Cout, H, W = 2, 4, 8, 16, 16
    keys = jax.random.split(jax.random.PRNGKey(0), 13)

    x = jax.random.normal(keys[0], (B, Cin, H, W), jnp.float32)

    w1 = 0.1 * jax.random.normal(keys[1], (Cout, Cin, 3, 3), jnp.float32)
    cb1 = 0.1 * jax.random.normal(keys[2], (Cout,), jnp.float32)
    g1 = 1.0 + 0.1 * jax.random.normal(keys[3], (Cout,), jnp.float32)
    be1 = 0.1 * jax.random.normal(keys[4], (Cout,), jnp.float32)
    m1 = 0.1 * jax.random.normal(keys[5], (Cout,), jnp.float32)
    v1 = jnp.abs(jax.random.normal(keys[6], (Cout,), jnp.float32)) + 0.5

    w2 = 0.1 * jax.random.normal(keys[7], (Cout, Cout, 3, 3), jnp.float32)
    cb2 = 0.1 * jax.random.normal(keys[8], (Cout,), jnp.float32)
    g2 = 1.0 + 0.1 * jax.random.normal(keys[9], (Cout,), jnp.float32)
    be2 = 0.1 * jax.random.normal(keys[10], (Cout,), jnp.float32)
    m2 = 0.1 * jax.random.normal(keys[11], (Cout,), jnp.float32)
    v2 = jnp.abs(jax.random.normal(keys[12], (Cout,), jnp.float32)) + 0.5

    params = (w1, cb1, g1, be1, m1, v1, w2, cb2, g2, be2, m2, v2)

    ref = jax.block_until_ready(reference_forward(x, *params))
    out = jax.block_until_ready(down_forward(x, *params))

    assert out.shape == (B, Cout, H // 2, W // 2), out.shape
    # bf16 MXU operands with f32 accumulation -> slightly looser tolerance.
    assert jnp.allclose(out, ref, rtol=2e-2, atol=2e-2), \
        float(jnp.max(jnp.abs(out - ref)))

    print("KERNEL_OK")
</pallas_src>

<mosaic_0001>
module attributes {stable_mosaic.version = 11 : i64} {
  func.func @k(%arg0: memref<1x8x8x4xbf16, #tpu.memory_space<vmem>>, %arg1: memref<1x8x8x4xbf16, #tpu.memory_space<vmem>>) attributes {dimension_semantics = [], scalar_prefetch = 0 : i64, scratch_operands = 0 : i64, tpu.core_type = #tpu.core_type<tc>} {
    %c0 = arith.constant 0 : index
    %c0_0 = arith.constant 0 : index
    %c0_1 = arith.constant 0 : index
    %c0_2 = arith.constant 0 : index
    %0 = vector.load %arg0[%c0, %c0_0, %c0_1, %c0_2] : memref<1x8x8x4xbf16, #tpu.memory_space<vmem>>, vector<1x8x8x4xbf16>
    %c1_i32 = arith.constant 1 : i32
    %1 = tpu.dynamic_rotate %0 by %c1_i32 dim 2 : vector<1x8x8x4xbf16>, i32 -> vector<1x8x8x4xbf16>
    %c0_3 = arith.constant 0 : index
    %c0_4 = arith.constant 0 : index
    %c0_5 = arith.constant 0 : index
    %c0_6 = arith.constant 0 : index
    %2 = vector.load %arg1[%c0_3, %c0_4, %c0_5, %c0_6] : memref<1x8x8x4xbf16, #tpu.memory_space<vmem>>, vector<1x8x8x4xbf16>
    tpu.vector_store %arg1[%c0_3, %c0_4, %c0_5, %c0_6], %1 {strides = array<i32>} : memref<1x8x8x4xbf16, #tpu.memory_space<vmem>>, vector<1x8x8x4xbf16>,
    return
  }
}

module attributes {stable_mosaic.version = 11 : i64} {
  func.func @_down_kernel(%arg0: i32, %arg1: memref<1x32x8x4xbf16, #tpu.memory_space<vmem>>, %arg2: memref<36x8xbf16, #tpu.memory_space<vmem>>, %arg3: memref<1x8xf32, #tpu.memory_space<vmem>>, %arg4: memref<1x8xf32, #tpu.memory_space<vmem>>, %arg5: memref<72x8xbf16, #tpu.memory_space<vmem>>, %arg6: memref<1x8xf32, #tpu.memory_space<vmem>>, %arg7: memref<1x8xf32, #tpu.memory_space<vmem>>, %arg8: memref<1x8x64xf32, #tpu.memory_space<vmem>>) attributes {dimension_semantics = [#tpu.dimension_semantics<parallel>], iteration_bounds = array<i64: 2>, scalar_prefetch = 0 : i64, scratch_operands = 0 : i64, tpu.core_type = #tpu.core_type<tc>, window_params = [{transform_indices = @transform_0, window_bounds = array<i64: 1, 32, 8, 4>}, {pipeline_mode = #tpu.pipeline_mode<synchronous>, transform_indices = @transform_1, window_bounds = array<i64: 36, 8>}, {pipeline_mode = #tpu.pipeline_mode<synchronous>, transform_indices = @transform_2, window_bounds = array<i64: 1, 8>}, {pipeline_mode = #tpu.pipeline_mode<synchronous>, transform_indices = @transform_3, window_bounds = array<i64: 1, 8>}, {pipeline_mode = #tpu.pipeline_mode<synchronous>, transform_indices = @transform_4, window_bounds = array<i64: 72, 8>}, {pipeline_mode = #tpu.pipeline_mode<synchronous>, transform_indices = @transform_5, window_bounds = array<i64: 1, 8>}, {pipeline_mode = #tpu.pipeline_mode<synchronous>, transform_indices = @transform_6, window_bounds = array<i64: 1, 8>}, {transform_indices = @transform_7, window_bounds = array<i64: 1, 8, 64>}]} {
    %c0 = arith.constant 0 : index
    %c0_0 = arith.constant 0 : index
    %c0_1 = arith.constant 0 : index
    %c0_2 = arith.constant 0 : index
    %0 = vector.load %arg1[%c0, %c0_0, %c0_1, %c0_2] : memref<1x32x8x4xbf16, #tpu.memory_space<vmem>>, vector<1x32x8x4xbf16>
    %1 = vector.extract_strided_slice %0 {offsets = [0, 0, 0, 0], sizes = [1, 8, 8, 4], strides = [1, 1, 1, 1]} : vector<1x32x8x4xbf16> to vector<1x8x8x4xbf16>
    %2 = vector.extract_strided_slice %0 {offsets = [0, 8, 0, 0], sizes = [1, 8, 8, 4], strides = [1, 1, 1, 1]} : vector<1x32x8x4xbf16> to vector<1x8x8x4xbf16>
    %3 = arith.maximumf %1, %2 : vector<1x8x8x4xbf16>
    %4 = vector.extract_strided_slice %0 {offsets = [0, 16, 0, 0], sizes = [1, 8, 8, 4], strides = [1, 1, 1, 1]} : vector<1x32x8x4xbf16> to vector<1x8x8x4xbf16>
    %5 = vector.extract_strided_slice %0 {offsets = [0, 24, 0, 0], sizes = [1, 8, 8, 4], strides = [1, 1, 1, 1]} : vector<1x32x8x4xbf16> to vector<1x8x8x4xbf16>
    %6 = arith.maximumf %4, %5 : vector<1x8x8x4xbf16>
    %7 = arith.maximumf %3, %6 : vector<1x8x8x4xbf16>
    %cst = arith.constant 0.000000e+00 : bf16
    %8 = vector.broadcast %cst : bf16 to vector<1x1x8x4xbf16>
    %9 = vector.extract_strided_slice %7 {offsets = [0, 0, 0, 0], sizes = [1, 7, 8, 4], strides = [1, 1, 1, 1]} : vector<1x8x8x4xbf16> to vector<1x7x8x4xbf16>
    %10 = tpu.concatenate %8, %9 in 1 : vector<1x1x8x4xbf16>, vector<1x7x8x4xbf16> -> vector<1x8x8x4xbf16>
    %11 = vector.extract_strided_slice %10 {offsets = [0, 0, 7, 0], sizes = [1, 8, 1, 4], strides = [1, 1, 1, 1]} : vector<1x8x8x4xbf16> to vector<1x8x1x4xbf16>
    %12 = vector.extract_strided_slice %10 {offsets = [0, 0, 0, 0], sizes = [1, 8, 7, 4], strides = [1, 1, 1, 1]} : vector<1x8x8x4xbf16> to vector<1x8x7x4xbf16>
    %13 = tpu.concatenate %11, %12 in 2 : vector<1x8x1x4xbf16>, vector<1x8x7x4xbf16> -> vector<1x8x8x4xbf16>
    %14 = vector.extract_strided_slice %10 {offsets = [0, 0, 1, 0], sizes = [1, 8, 7, 4], strides = [1, 1, 1, 1]} : vector<1x8x8x4xbf16> to vector<1x8x7x4xbf16>
    %15 = vector.extract_strided_slice %10 {offsets = [0, 0, 0, 0], sizes = [1, 8, 1, 4], strides = [1, 1, 1, 1]} : vector<1x8x8x4xbf16> to vector<1x8x1x4xbf16>
    %16 = tpu.concatenate %14, %15 in 2 : vector<1x8x7x4xbf16>, vector<1x8x1x4xbf16> -> vector<1x8x8x4xbf16>
    %17 = vector.extract_strided_slice %7 {offsets = [0, 0, 7, 0], sizes = [1, 8, 1, 4], strides = [1, 1, 1, 1]} : vector<1x8x8x4xbf16> to vector<1x8x1x4xbf16>
    %18 = vector.extract_strided_slice %7 {offsets = [0, 0, 0, 0], sizes = [1, 8, 7, 4], strides = [1, 1, 1, 1]} : vector<1x8x8x4xbf16> to vector<1x8x7x4xbf16>
    %19 = tpu.concatenate %17, %18 in 2 : vector<1x8x1x4xbf16>, vector<1x8x7x4xbf16> -> vector<1x8x8x4xbf16>
    %20 = vector.extract_strided_slice %7 {offsets = [0, 0, 1, 0], sizes = [1, 8, 7, 4], strides = [1, 1, 1, 1]} : vector<1x8x8x4xbf16> to vector<1x8x7x4xbf16>
    %21 = vector.extract_strided_slice %7 {offsets = [0, 0, 0, 0], sizes = [1, 8, 1, 4], strides = [1, 1, 1, 1]} : vector<1x8x8x4xbf16> to vector<1x8x1x4xbf16>
    %22 = tpu.concatenate %20, %21 in 2 : vector<1x8x7x4xbf16>, vector<1x8x1x4xbf16> -> vector<1x8x8x4xbf16>
    %23 = vector.extract_strided_slice %7 {offsets = [0, 1, 0, 0], sizes = [1, 7, 8, 4], strides = [1, 1, 1, 1]} : vector<1x8x8x4xbf16> to vector<1x7x8x4xbf16>
    %24 = tpu.concatenate %23, %8 in 1 : vector<1x7x8x4xbf16>, vector<1x1x8x4xbf16> -> vector<1x8x8x4xbf16>
    %25 = vector.extract_strided_slice %24 {offsets = [0, 0, 7, 0], sizes = [1, 8, 1, 4], strides = [1, 1, 1, 1]} : vector<1x8x8x4xbf16> to vector<1x8x1x4xbf16>
    %26 = vector.extract_strided_slice %24 {offsets = [0, 0, 0, 0], sizes = [1, 8, 7, 4], strides = [1, 1, 1, 1]} : vector<1x8x8x4xbf16> to vector<1x8x7x4xbf16>
    %27 = tpu.concatenate %25, %26 in 2 : vector<1x8x1x4xbf16>, vector<1x8x7x4xbf16> -> vector<1x8x8x4xbf16>
    %28 = vector.extract_strided_slice %24 {offsets = [0, 0, 1, 0], sizes = [1, 8, 7, 4], strides = [1, 1, 1, 1]} : vector<1x8x8x4xbf16> to vector<1x8x7x4xbf16>
    %29 = vector.extract_strided_slice %24 {offsets = [0, 0, 0, 0], sizes = [1, 8, 1, 4], strides = [1, 1, 1, 1]} : vector<1x8x8x4xbf16> to vector<1x8x1x4xbf16>
    %30 = tpu.concatenate %28, %29 in 2 : vector<1x8x7x4xbf16>, vector<1x8x1x4xbf16> -> vector<1x8x8x4xbf16>
    %31 = tpu.concatenate %13, %10, %16, %19, %7, %22, %27, %24, %30 in 3 : vector<1x8x8x4xbf16>, vector<1x8x8x4xbf16>, vector<1x8x8x4xbf16>, vector<1x8x8x4xbf16>, vector<1x8x8x4xbf16>, vector<1x8x8x4xbf16>, vector<1x8x8x4xbf16>, vector<1x8x8x4xbf16>, vector<1x8x8x4xbf16> -> vector<1x8x8x36xbf16>
    %32 = vector.shape_cast %31 : vector<1x8x8x36xbf16> to vector<64x36xbf16>
    %c0_3 = arith.constant 0 : index
    %c0_4 = arith.constant 0 : index
    %33 = vector.load %arg2[%c0_3, %c0_4] : memref<36x8xbf16, #tpu.memory_space<vmem>>, vector<36x8xbf16>
    %cst_5 = arith.constant dense<0.000000e+00> : vector<64x8xf32>
    %34 = tpu.matmul %32, %33, %cst_5 {dimension_numbers = #tpu.dot_dimension_numbers<[1], [0], [0], [1], [0, 0, 1, 1], [], []>} : vector<64x36xbf16>, vector<36x8xbf16>, vector<64x8xf32> -> vector<64x8xf32>
    %c0_6 = arith.constant 0 : index
    %c0_7 = arith.constant 0 : index
    %35 = vector.load %arg3[%c0_6, %c0_7] : memref<1x8xf32, #tpu.memory_space<vmem>>, vector<1x8xf32>
    %36 = vector.broadcast %35 : vector<1x8xf32> to vector<64x8xf32>
    %37 = arith.mulf %34, %36 : vector<64x8xf32>
    %c0_8 = arith.constant 0 : index
    %c0_9 = arith.constant 0 : index
    %38 = vector.load %arg4[%c0_8, %c0_9] : memref<1x8xf32, #tpu.memory_space<vmem>>, vector<1x8xf32>
    %39 = vector.broadcast %38 : vector<1x8xf32> to vector<64x8xf32>
    %40 = arith.addf %37, %39 : vector<64x8xf32>
    %cst_10 = arith.constant 0.00999999977 : f32
    %41 = vector.broadcast %cst_10 : f32 to vector<64x8xf32>
    %42 = arith.mulf %41, %40 : vector<64x8xf32>
    %43 = arith.maximumf %40, %42 : vector<64x8xf32>
    %44 = arith.truncf %43 : vector<64x8xf32> to vector<64x8xbf16>
    %45 = vector.shape_cast %44 : vector<64x8xbf16> to vector<1x8x8x8xbf16>
    %cst_11 = arith.constant 0.000000e+00 : bf16
    %46 = vector.broadcast %cst_11 : bf16 to vector<1x1x8x8xbf16>
    %47 = vector.extract_strided_slice %45 {offsets = [0, 0, 0, 0], sizes = [1, 7, 8, 8], strides = [1, 1, 1, 1]} : vector<1x8x8x8xbf16> to vector<1x7x8x8xbf16>
    %48 = tpu.concatenate %46, %47 in 1 : vector<1x1x8x8xbf16>, vector<1x7x8x8xbf16> -> vector<1x8x8x8xbf16>
    %49 = vector.extract_strided_slice %48 {offsets = [0, 0, 7, 0], sizes = [1, 8, 1, 8], strides = [1, 1, 1, 1]} : vector<1x8x8x8xbf16> to vector<1x8x1x8xbf16>
    %50 = vector.extract_strided_slice %48 {offsets = [0, 0, 0, 0], sizes = [1, 8, 7, 8], strides = [1, 1, 1, 1]} : vector<1x8x8x8xbf16> to vector<1x8x7x8xbf16>
    %51 = tpu.concatenate %49, %50 in 2 : vector<1x8x1x8xbf16>, vector<1x8x7x8xbf16> -> vector<1x8x8x8xbf16>
    %52 = vector.extract_strided_slice %48 {offsets = [0, 0, 1, 0], sizes = [1, 8, 7, 8], strides = [1, 1, 1, 1]} : vector<1x8x8x8xbf16> to vector<1x8x7x8xbf16>
    %53 = vector.extract_strided_slice %48 {offsets = [0, 0, 0, 0], sizes = [1, 8, 1, 8], strides = [1, 1, 1, 1]} : vector<1x8x8x8xbf16> to vector<1x8x1x8xbf16>
    %54 = tpu.concatenate %52, %53 in 2 : vector<1x8x7x8xbf16>, vector<1x8x1x8xbf16> -> vector<1x8x8x8xbf16>
    %55 = vector.extract_strided_slice %45 {offsets = [0, 0, 7, 0], sizes = [1, 8, 1, 8], strides = [1, 1, 1, 1]} : vector<1x8x8x8xbf16> to vector<1x8x1x8xbf16>
    %56 = vector.extract_strided_slice %45 {offsets = [0, 0, 0, 0], sizes = [1, 8, 7, 8], strides = [1, 1, 1, 1]} : vector<1x8x8x8xbf16> to vector<1x8x7x8xbf16>
    %57 = tpu.concatenate %55, %56 in 2 : vector<1x8x1x8xbf16>, vector<1x8x7x8xbf16> -> vector<1x8x8x8xbf16>
    %58 = vector.extract_strided_slice %45 {offsets = [0, 0, 1, 0], sizes = [1, 8, 7, 8], strides = [1, 1, 1, 1]} : vector<1x8x8x8xbf16> to vector<1x8x7x8xbf16>
    %59 = vector.extract_strided_slice %45 {offsets = [0, 0, 0, 0], sizes = [1, 8, 1, 8], strides = [1, 1, 1, 1]} : vector<1x8x8x8xbf16> to vector<1x8x1x8xbf16>
    %60 = tpu.concatenate %58, %59 in 2 : vector<1x8x7x8xbf16>, vector<1x8x1x8xbf16> -> vector<1x8x8x8xbf16>
    %61 = vector.extract_strided_slice %45 {offsets = [0, 1, 0, 0], sizes = [1, 7, 8, 8], strides = [1, 1, 1, 1]} : vector<1x8x8x8xbf16> to vector<1x7x8x8xbf16>
    %62 = tpu.concatenate %61, %46 in 1 : vector<1x7x8x8xbf16>, vector<1x1x8x8xbf16> -> vector<1x8x8x8xbf16>
    %63 = vector.extract_strided_slice %62 {offsets = [0, 0, 7, 0], sizes = [1, 8, 1, 8], strides = [1, 1, 1, 1]} : vector<1x8x8x8xbf16> to vector<1x8x1x8xbf16>
    %64 = vector.extract_strided_slice %62 {offsets = [0, 0, 0, 0], sizes = [1, 8, 7, 8], strides = [1, 1, 1, 1]} : vector<1x8x8x8xbf16> to vector<1x8x7x8xbf16>
    %65 = tpu.concatenate %63, %64 in 2 : vector<1x8x1x8xbf16>, vector<1x8x7x8xbf16> -> vector<1x8x8x8xbf16>
    %66 = vector.extract_strided_slice %62 {offsets = [0, 0, 1, 0], sizes = [1, 8, 7, 8], strides = [1, 1, 1, 1]} : vector<1x8x8x8xbf16> to vector<1x8x7x8xbf16>
    %67 = vector.extract_strided_slice %62 {offsets = [0, 0, 0, 0], sizes = [1, 8, 1, 8], strides = [1, 1, 1, 1]} : vector<1x8x8x8xbf16> to vector<1x8x1x8xbf16>
    %68 = tpu.concatenate %66, %67 in 2 : vector<1x8x7x8xbf16>, vector<1x8x1x8xbf16> -> vector<1x8x8x8xbf16>
    %69 = tpu.concatenate %51, %48, %54, %57, %45, %60, %65, %62, %68 in 3 : vector<1x8x8x8xbf16>, vector<1x8x8x8xbf16>, vector<1x8x8x8xbf16>, vector<1x8x8x8xbf16>, vector<1x8x8x8xbf16>, vector<1x8x8x8xbf16>, vector<1x8x8x8xbf16>, vector<1x8x8x8xbf16>, vector<1x8x8x8xbf16> -> vector<1x8x8x72xbf16>
    %70 = vector.shape_cast %69 : vector<1x8x8x72xbf16> to vector<64x72xbf16>
    %c0_12 = arith.constant 0 : index
    %c0_13 = arith.constant 0 : index
    %71 = vector.load %arg5[%c0_12, %c0_13] : memref<72x8xbf16, #tpu.memory_space<vmem>>, vector<72x8xbf16>
    %cst_14 = arith.constant dense<0.000000e+00> : vector<64x8xf32>
    %72 = tpu.matmul %70, %71, %cst_14 {dimension_numbers = #tpu.dot_dimension_numbers<[1], [0], [0], [1], [0, 0, 1, 1], [], []>} : vector<64x72xbf16>, vector<72x8xbf16>, vector<64x8xf32> -> vector<64x8xf32>
    %c0_15 = arith.constant 0 : index
    %c0_16 = arith.constant 0 : index
    %73 = vector.load %arg6[%c0_15, %c0_16] : memref<1x8xf32, #tpu.memory_space<vmem>>, vector<1x8xf32>
    %74 = vector.broadcast %73 : vector<1x8xf32> to vector<64x8xf32>
    %75 = arith.mulf %72, %74 : vector<64x8xf32>
    %c0_17 = arith.constant 0 : index
    %c0_18 = arith.constant 0 : index
    %76 = vector.load %arg7[%c0_17, %c0_18] : memref<1x8xf32, #tpu.memory_space<vmem>>, vector<1x8xf32>
    %77 = vector.broadcast %76 : vector<1x8xf32> to vector<64x8xf32>
    %78 = arith.addf %75, %77 : vector<64x8xf32>
    %cst_19 = arith.constant 0.00999999977 : f32
    %79 = vector.broadcast %cst_19 : f32 to vector<64x8xf32>
    %80 = arith.mulf %79, %78 : vector<64x8xf32>
    %81 = arith.maximumf %78, %80 : vector<64x8xf32>
    %82 = vector.shape_cast %81 : vector<64x8xf32> to vector<1x64x8xf32>
    %83 = tpu.transpose %82, [0, 2, 1] : vector<1x64x8xf32> -> vector<1x8x64xf32>
    %c0_20 = arith.constant 0 : index
    %c0_21 = arith.constant 0 : index
    %c0_22 = arith.constant 0 : index
    %84 = vector.load %arg8[%c0_20, %c0_21, %c0_22] : memref<1x8x64xf32, #tpu.memory_space<vmem>>, vector<1x8x64xf32>
    tpu.vector_store %arg8[%c0_20, %c0_21, %c0_22], %83 {strides = array<i32>} : memref<1x8x64xf32, #tpu.memory_space<vmem>>, vector<1x8x64xf32>,
    return
  }
  func.func @transform_0(%arg0: i32) -> (i32, i32, i32, i32) {
    %c0_i32 = arith.constant 0 : i32
    %c0_i32_0 = arith.constant 0 : i32
    %c0_i32_1 = arith.constant 0 : i32
    %c0_i32_2 = arith.constant 0 : i32
    return %arg0, %c0_i32, %c0_i32_0, %c0_i32_1 : i32, i32, i32, i32
  }
  func.func @transform_1(%arg0: i32) -> (i32, i32) {
    %c0_i32 = arith.constant 0 : i32
    %c0_i32_0 = arith.constant 0 : i32
    %c0_i32_1 = arith.constant 0 : i32
    return %c0_i32, %c0_i32_0 : i32, i32
  }
  func.func @transform_2(%arg0: i32) -> (i32, i32) {
    %c0_i32 = arith.constant 0 : i32
    %c0_i32_0 = arith.constant 0 : i32
    %c0_i32_1 = arith.constant 0 : i32
    return %c0_i32, %c0_i32_0 : i32, i32
  }
  func.func @transform_3(%arg0: i32) -> (i32, i32) {
    %c0_i32 = arith.constant 0 : i32
    %c0_i32_0 = arith.constant 0 : i32
    %c0_i32_1 = arith.constant 0 : i32
    return %c0_i32, %c0_i32_0 : i32, i32
  }
  func.func @transform_4(%arg0: i32) -> (i32, i32) {
    %c0_i32 = arith.constant 0 : i32
    %c0_i32_0 = arith.constant 0 : i32
    %c0_i32_1 = arith.constant 0 : i32
    return %c0_i32, %c0_i32_0 : i32, i32
  }
  func.func @transform_5(%arg0: i32) -> (i32, i32) {
    %c0_i32 = arith.constant 0 : i32
    %c0_i32_0 = arith.constant 0 : i32
    %c0_i32_1 = arith.constant 0 : i32
    return %c0_i32, %c0_i32_0 : i32, i32
  }
  func.func @transform_6(%arg0: i32) -> (i32, i32) {
    %c0_i32 = arith.constant 0 : i32
    %c0_i32_0 = arith.constant 0 : i32
    %c0_i32_1 = arith.constant 0 : i32
    return %c0_i32, %c0_i32_0 : i32, i32
  }
  func.func @transform_7(%arg0: i32) -> (i32, i32, i32) {
    %c0_i32 = arith.constant 0 : i32
    %c0_i32_0 = arith.constant 0 : i32
    %c0_i32_1 = arith.constant 0 : i32
    return %arg0, %c0_i32, %c0_i32_0 : i32, i32, i32
  }
}

</mosaic_0001>

<bundles_post_ra>
// kernel: tpu_custom_call.1
= control target key start
LH: loop header
LB: loop body
LE: loop exit
PB: predicated region body
PF: predicated region fallthrough
CT: control target
= control target key end

     0   :  { %12 = vsyncpa [#allocation3], 0  ;;  %s3006_s0 = inlined_call_operand.vmem [shape: bf16[2,32,8,4], index: 0, kind: input, shape index: {}]   ;;  %s3007_s1 = inlined_call_operand.vmem [shape: bf16[36,8], index: 1, kind: input, shape index: {}]   ;;  %s3008_s2 = inlined_call_operand.vmem [shape: f32[1,8], index: 2, kind: input, shape index: {}]   ;;  %s3009_s3 = inlined_call_operand.vmem [shape: f32[1,8], index: 3, kind: input, shape index: {}]   ;;  %s3010_s4 = inlined_call_operand.vmem [shape: bf16[72,8], index: 4, kind: input, shape index: {}]   ;;  %s3011_s5 = inlined_call_operand.vmem [shape: f32[1,8], index: 5, kind: input, shape index: {}]   ;;  %s3012_s6 = inlined_call_operand.vmem [shape: f32[1,8], index: 6, kind: input, shape index: {}]   ;;  %s3013_s7 = inlined_call_operand.hbm [shape: f32[2,8,64], index: 7, kind: output, shape index: {}]  }
   0x1   :  { %14 = vsyncpa [#allocation3 + $0x1], 0  ;;  %s2149_s24 = smov 0   ;;  %s2151_s25 = smov 0  }
   0x2   :  { %s2153_s26 = smov 0   ;;  %s2155_s27 = smov 0  }
   0x3 LB: > { %s2170_s28 = sadd.s32 4294967295, %s2093_s27   ;;  %s1855_s29 = sadd.s32 4294967294, %s2093_s27   ;;  %s2093_s27 = sphi %s2155_s27, %s3023_s27   ;;  %s2089_s26 = sphi %s2153_s26, %s3022_s26   ;;  %s2085_s25 = sphi %s2151_s25, %s3021_s25   ;;  %s2081_s24 = sphi %s2149_s24, %s3020_s24  }
   0x4   : > { %s2174_s30 = sadd.s32 1, %s2093_s27   ;;  %s179_s8 = sadd.s32 1, %s2089_s26 }
   0x5   : > { %s176_s9 = ssub.s32 %s2093_s27, %s2174_s30  ;;  %p189_p0 = scmp.ne.s32.totalorder %s2089_s26, %s2085_s25 }
   0x6   : > { %p177_p1 = scmp.eq.s32.totalorder %s176_s9, 0  ;;  %p190_p2 = scmp.eq.s32.totalorder %s2170_s28, 1 }
   0x7   : > { %p195_p3 = scmp.ne.s32.totalorder %s2085_s25, %s2081_s24  ;;  %p196_p4 = scmp.eq.s32.totalorder %s1855_s29, 1 }
   0x8   : > { %s2185_s10 = scalar_select %p177_p1, %s2089_s26, %s179_s8  }
   0x9   : > { %p2187_p5 = por %p190_p2, %p189_p0  ;;  %p2191_p6 = por %p196_p4, %p195_p3 }
   0xa   : > { %p1858_p7 = scmp.ge.s32.totalorder %s2093_s27, 1  ;;  %p240_p8 = scmp.lt.s32.totalorder %s2093_s27, 3 }
   0xc   : > { %p241_p9 = pnand %p1858_p7, %p240_p8 }
   0xd   : > { %vm465_vm0 = vcmask (!%p241_p9), 1043456   ;;  %vm466_vm1 = vsmask.f32 (!%p241_p9), 3328  ;;  %v2095_v0 = vmov (!%p241_p9), 0   ;;  %s2096_s13 = smov (!%p241_p9), 4   ;;  %p272_p10 = scmp.lt.s32.totalorder (!%p241_p9), %s2170_s28, 1 }
   0xe   : > { %244 = sbr.rel (%p241_p9) target bundleno = 1043 (0x413), region = 48  ;;  %656 = vrot.lane.b32.xlu0 (!%p241_p9), %v2095_v0, %s2096_s13  ;;  %v425_v1 = vrot.slane (!%p241_p9), %v2095_v0, 1  ;;  %v449_v2 = vrot.slane (!%p241_p9), %v2095_v0, 5  ;;  %vm2202_vm2 = vmand (!%p241_p9), %vm465_vm0, %vm466_vm1  ;;  %s2097_s15 = smov (!%p241_p9), 8   ;;  %vm414_vm3 = vcmask (!%p241_p9), 1040384   ;;  %vm1007_vm6 = vcmask (!%p241_p9), 1041408  }
   0xf   : > { %vm415_vm4 = vsmask.f32 (!%p241_p9), 256  ;;  %s2098_s20 = smov (!%p241_p9), 12   ;;  %s2099_s21 = smov (!%p241_p9), 16   ;;  %vm810_vm7 = vcmask (!%p241_p9), 31744   ;;  %vm835_vm8 = vcmask (!%p241_p9), 64512  }
  0x10   : > { %v2209_v4 = vsel (!%p241_p9), %vm2202_vm2, %v425_v1, %v449_v2  ;;  %vm2269_vm5 = vmand (!%p241_p9), %vm414_vm3, %vm415_vm4  ;;  %s2100_s22 = smov (!%p241_p9), 20   ;;  %s2101_s23 = smov (!%p241_p9), 24   ;;  %vm852_vm9 = vcmask (!%p241_p9), 97280   ;;  %vm869_vm10 = vcmask (!%p241_p9), 130048   ;;  %vm886_vm11 = vcmask (!%p241_p9), 162816  }
  0x11   : > { %s2102_s9 = smov (!%p241_p9), 28   ;;  %s2103_s29 = smov (!%p241_p9), 32   ;;  %vm903_vm12 = vcmask (!%p241_p9), 195584   ;;  %vm920_vm13 = vcmask (!%p241_p9), 228352   ;;  %vm937_vm14 = vcmask (!%p241_p9), 261120   ;;  %vm994_vm15 = vcmask (!%p241_p9), 293888  }
  0x12   : > { %680 = vrot.lane.b32.xlu0 (!%p241_p9), %v2209_v4, %s2097_s15  ;;  %vm1514_vm1 = vcmask (!%p241_p9), 392192   ;;  %vm1548_vm3 = vcmask (!%p241_p9), 523264   ;;  %vm1621_vm4 = vcmask (!%p241_p9), 588800  }
  0x15   : > { %s273_s14 = scalar_select %p272_p10, %s2170_s28, 1 }
  0x17   : > { %s1911_s16 = sshll.u32 %s273_s14, 7  ;;  %s2106_s14 = smov 64  }
  0x18   : > { %s2217_s19 = scalar_lea.vmem %s3006_s0, %s1911_s16  ;;  %s2107_s16 = smov 40  }
  0x19   : > { %v279_v5 = vld [vmem:[%s2217_s19 + $0x4] sm:$0xf]  ;;  %v278_v10 = vld [vmem:[%s2217_s19] sm:$0xf]  ;;  %v280_v16 = vld [vmem:[%s2217_s19 + $0x8] sm:$0xf] }
  0x1a   : > { %v287_v6 = vld [vmem:[%s2217_s19 + $0x24] sm:$0xf]  ;;  %v286_v11 = vld [vmem:[%s2217_s19 + $0x20] sm:$0xf]  ;;  %v288_v18 = vld [vmem:[%s2217_s19 + $0x28] sm:$0xf] }
  0x1b   : > { %v295_v7 = vld [vmem:[%s2217_s19 + $0x44] sm:$0xf]  ;;  %v311_v9 = vmax.bf16 %v287_v6, %v279_v5  ;;  %v294_v13 = vld [vmem:[%s2217_s19 + $0x40] sm:$0xf]  ;;  %v310_v15 = vmax.bf16 %v286_v11, %v278_v10  ;;  %v296_v19 = vld [vmem:[%s2217_s19 + $0x48] sm:$0xf]  ;;  %v312_v22 = vmax.bf16 %v288_v18, %v280_v16 }
  0x1c   : > { %v303_v8 = vld [vmem:[%s2217_s19 + $0x64] sm:$0xf]  ;;  %v302_v14 = vld [vmem:[%s2217_s19 + $0x60] sm:$0xf]  ;;  %v304_v20 = vld [vmem:[%s2217_s19 + $0x68] sm:$0xf] }
  0x1d   : > { %v319_v12 = vmax.bf16 %v303_v8, %v295_v7  ;;  %v318_v17 = vmax.bf16 %v302_v14, %v294_v13  ;;  %v320_v23 = vmax.bf16 %v304_v20, %v296_v19  ;;  %v281_v24 = vld [vmem:[%s2217_s19 + $0xc] sm:$0xf]  ;;  %v282_v14 = vld [vmem:[%s2217_s19 + $0x10] sm:$0xf] }
  0x1e   : > { %v289_v25 = vld [vmem:[%s2217_s19 + $0x2c] sm:$0xf]  ;;  %v290_v16 = vld [vmem:[%s2217_s19 + $0x30] sm:$0xf] }
  0x1f   : > { %v327_v21 = vmax.bf16 %v319_v12, %v311_v9  ;;  %v297_v26 = vld [vmem:[%s2217_s19 + $0x4c] sm:$0xf]  ;;  %v326_v27 = vmax.bf16 %v318_v17, %v310_v15  ;;  %v313_v29 = vmax.bf16 %v289_v25, %v281_v24  ;;  %v328_v31 = vmax.bf16 %v320_v23, %v312_v22  ;;  %v298_v19 = vld [vmem:[%s2217_s19 + $0x50] sm:$0xf] }
  0x20   : > { %v305_v28 = vld [vmem:[%s2217_s19 + $0x6c] sm:$0xf]  ;;  %v306_v20 = vld [vmem:[%s2217_s19 + $0x70] sm:$0xf]  ;;  %v314_v23 = vmax.bf16 %v290_v16, %v282_v14  ;;  %v308_v16 = vld [vmem:[%s2217_s19 + $0x78] sm:$0xf] }
  0x21   : > { %660 = vrot.lane.b32.xlu1 %v327_v21, %s2096_s13  ;;  %v2236_v30 = vcombine.low %v327_v21, %v327_v21  ;;  %v2238_v32 = vshrl.u32 %v327_v21, 16  ;;  %v2240_v33 = vshll.u32 %v327_v21, 16  ;;  %658 = vrot.lane.b32.xlu0 %v326_v27, %s2096_s13  ;;  %v2243_v34 = vshrl.u32 %v326_v27, 16 }
  0x22   : > { %v2245_v35 = vshll.u32 %v326_v27, 16  ;;  %v1862_v36 = vcombine.low %v326_v27, %v326_v27  ;;  %v321_v37 = vmax.bf16 %v305_v28, %v297_v26  ;;  %v2247_v38 = vcombine.low %v328_v31, %v328_v31 }
  0x23   : > { %v429_v39 = vrot.slane %v2240_v33, 1  ;;  %v451_v40 = vrot.slane %v2240_v33, 5  ;;  %v2251_v41 = vshrl.u32 %v328_v31, 16  ;;  %v2257_v47 = vshll.u32 %v328_v31, 16 }
  0x24   : > { %v427_v42 = vrot.slane %v2245_v35, 1  ;;  %v450_v43 = vrot.slane %v2245_v35, 5  ;;  %v501_v44 = vshrl.u32 %v1862_v36, 16  ;;  %v541_v45 = vshll.u32 %v1862_v36, 16 }
  0x25   : > { %662 = vrot.lane.b32.xlu1 %v328_v31, %s2096_s13  ;;  %v430_v46 = vor.u32 %v429_v39, %v2238_v32  ;;  %v509_v48 = vshrl.u32 %v2247_v38, 16  ;;  %v2261_v49 = vshll.u32 %v2247_v38, 16  ;;  %v505_v53 = vshrl.u32 %v2236_v30, 16 }
  0x26   : > { %v428_v50 = vor.u32 %v427_v42, %v2243_v34  ;;  %v503_v51 = vrot.slane %v501_v44, 3  ;;  %v540_v52 = vrot.slane %v501_v44, 7  ;;  %v431_v56 = vrot.slane %v2257_v47, 1 }
  0x27   : > { %v470_v54 = vsel %vm2202_vm2, %v430_v46, %v451_v40  ;;  %v452_v57 = vrot.slane %v2257_v47, 5  ;;  %v511_v60 = vrot.slane %v509_v48, 3  ;;  %v548_v61 = vrot.slane %v509_v48, 7 }
  0x28   : > { %684 = vrot.lane.b32.xlu0 %v470_v54, %s2097_s15  ;;  %v469_v58 = vsel %vm2202_vm2, %v428_v50, %v450_v43  ;;  %v543_v59 = vor.u32 %v541_v45, %v540_v52  ;;  %v432_v62 = vor.u32 %v431_v56, %v2251_v41  ;;  %v544_v63 = vrot.slane %v505_v53, 7 }
  0x29   : > { %682 = vrot.lane.b32.xlu1 %v469_v58, %s2097_s15  ;;  %v545_v1 = vshll.u32 %v2236_v30, 16  ;;  %v2281_v2 = vmax.bf16 %v321_v37, %v313_v29  ;;  %v551_v6 = vor.u32 %v2261_v49, %v548_v61  ;;  %v507_v7 = vrot.slane %v505_v53, 3 }
  0x2a   : > { %v580_v5 = vsel %vm2269_vm5, %v503_v51, %v543_v59  ;;  %v471_v8 = vsel %vm2202_vm2, %v432_v62, %v452_v57  ;;  %v588_v22 = vrot.slane %v541_v45, 1  ;;  %v322_v24 = vmax.bf16 %v306_v20, %v298_v19  ;;  %v299_v62 = vld [vmem:[%s2217_s19 + $0x54] sm:$0xf]  ;;  %v2023_v20 = vld [vmem:[%s3007_s1] sm:$0xff]  }
  0x2b   : > { %v547_v9 = vor.u32 %v545_v1, %v544_v63  ;;  %v2290_v10 = vcombine.low %v2281_v2, %v2281_v2  ;;  %v2296_v11 = vsel %vm2269_vm5, %v511_v60, %v551_v6  ;;  %v612_v27 = vrot.slane %v541_v45, 5  ;;  %v291_v60 = vld [vmem:[%s2217_s19 + $0x34] sm:$0xf]  ;;  %1936 = vmatprep.subr.bf16.mxu0 %v2023_v20 }
  0x2c   : > { %704 = vrot.lane.b32.xlu0 %v580_v5, %s2098_s20  ;;  %v589_v26 = vor.u32 %v588_v22, %v501_v44  ;;  %v592_v28 = vrot.slane %v2261_v49, 1  ;;  %v590_v29 = vrot.slane %v545_v1, 1  ;;  %v2314_v31 = vmax.bf16 %v322_v24, %v314_v23  ;;  %v307_v63 = vld [vmem:[%s2217_s19 + $0x74] sm:$0xf]  ;;  %1937 = vmatpush3.bf16.msra.mxu0 %v2023_v20 }
  0x2d   : > { %686 = vrot.lane.b32.xlu1 %v471_v8, %s2097_s15  ;;  %v513_v12 = vshrl.u32 %v2290_v10, 16  ;;  %v553_v13 = vshll.u32 %v2290_v10, 16  ;;  %v581_v15 = vsel %vm2269_vm5, %v507_v7, %v547_v9  ;;  %v613_v42 = vrot.slane %v545_v1, 5  ;;  %v284_v8 = vld [vmem:[%s2217_s19 + $0x18] sm:$0xf] }
  0x2e   : > { %v628_v37 = vsel %vm2202_vm2, %v589_v26, %v612_v27  ;;  %v593_v39 = vor.u32 %v592_v28, %v509_v48  ;;  %v591_v40 = vor.u32 %v590_v29, %v505_v53  ;;  %v2325_v44 = vcombine.low %v2314_v31, %v2314_v31  ;;  %v292_v9 = vld [vmem:[%s2217_s19 + $0x38] sm:$0xf]  ;;  %v2024_v28 = vld [vmem:[%s3007_s1 + $0x8] sm:$0xff]  }
  0x2f   : > { %v515_v17 = vrot.slane %v513_v12, 3  ;;  %v552_v18 = vrot.slane %v513_v12, 7  ;;  %v594_v43 = vrot.slane %v553_v13, 1  ;;  %v345_v51 = vrot.slane %v2238_v32, 3  ;;  %1938 = vmatprep.subr.bf16.mxu0 %v2024_v28 }
  0x30   : > { %708 = vrot.lane.b32.xlu0 %v2296_v11, %s2098_s20  ;;  %v2336_v46 = vsel %vm2202_vm2, %v591_v40, %v613_v42  ;;  %v2339_v50 = vshrl.u32 %v2325_v44, 16  ;;  %v382_v52 = vrot.slane %v2238_v32, 7  ;;  %v2353_v56 = vshll.u32 %v2325_v44, 16  ;;  %v283_v32 = vld [vmem:[%s2217_s19 + $0x14] sm:$0xf]  ;;  %1939 = vmatpush3.bf16.msra.mxu0 %v2024_v28 }
  0x31   : > { %706 = vrot.lane.b32.xlu1 %v581_v15, %s2098_s20  ;;  %v555_v21 = vor.u32 %v553_v13, %v552_v18  ;;  %v595_v48 = vor.u32 %v594_v43, %v513_v12  ;;  %v341_v58 = vrot.slane %v2243_v34, 3  ;;  %v378_v59 = vrot.slane %v2243_v34, 7 }
  0x32   : > { %v556_v54 = vrot.slane %v2339_v50, 7  ;;  %v385_v57 = vor.u32 %v2240_v33, %v382_v52  ;;  %v386_v61 = vrot.slane %v2251_v41, 7  ;;  %v349_v1 = vrot.slane %v2251_v41, 3 }
  0x33   : > { %v583_v25 = vsel %vm2269_vm5, %v515_v17, %v555_v21  ;;  %v381_v34 = vor.u32 %v2245_v35, %v378_v59  ;;  %v519_v5 = vrot.slane %v2339_v50, 3  ;;  %v2375_v7 = vshrl.u32 %v2281_v2, 16 }
  0x34   : > { %720 = vrot.lane.b32.xlu0 %v1862_v36, %s2099_s21  ;;  %v614_v36 = vrot.slane %v2261_v49, 5  ;;  %v615_v49 = vrot.slane %v553_v13, 5  ;;  %v2368_v33 = vsel %vm2269_vm5, %v345_v51, %v385_v57  ;;  %v559_v6 = vor.u32 %v2353_v56, %v556_v54 }
  0x35   : > { %710 = vrot.lane.b32.xlu1 %v583_v25, %s2098_s20  ;;  %v2381_v12 = vsel %vm2269_vm5, %v341_v58, %v381_v34  ;;  %v389_v13 = vor.u32 %v2257_v47, %v386_v61  ;;  %v315_v35 = vmax.bf16 %v291_v60, %v283_v32  ;;  %v323_v14 = vmax.bf16 %v307_v63, %v299_v62  ;;  %v285_v32 = vld [vmem:[%s2217_s19 + $0x1c] sm:$0xf] }
  0x36   : > { %v2332_v45 = vsel %vm2202_vm2, %v593_v39, %v614_v36  ;;  %v2349_v53 = vsel %vm2202_vm2, %v595_v48, %v615_v49  ;;  %v2386_v41 = vshll.u32 %v2281_v2, 16  ;;  %v2391_v17 = vshrl.u32 %v2314_v31, 16  ;;  %v2025_v49 = vld [vmem:[%s3007_s1 + $0x10] ss:$0 sps:$4 sm:$0x33]  }
  0x37   : > { %v2397_v18 = vsel %vm2269_vm5, %v349_v1, %v389_v13  ;;  %v353_v47 = vrot.slane %v2375_v7, 3  ;;  %v390_v19 = vrot.slane %v2375_v7, 7  ;;  %v2406_v21 = vsel %vm2269_vm5, %v519_v5, %v559_v6  ;;  %1968 = vmatprep.subr.msk.bf16.mxu0 %vm1007_vm6, %v2025_v49  ;;  %v293_v60 = vld [vmem:[%s2217_s19 + $0x3c] sm:$0xf] }
  0x38   : > { %724 = vrot.lane.b32.xlu0 %v2247_v38, %s2099_s21  ;;  %v316_v22 = vmax.bf16 %v292_v9, %v284_v8  ;;  %v331_v26 = vmax.bf16 %v323_v14, %v315_v35  ;;  %v357_v29 = vrot.slane %v2391_v17, 3  ;;  %v596_v59 = vrot.slane %v2353_v56, 1  ;;  %v301_v61 = vld [vmem:[%s2217_s19 + $0x5c] sm:$0xf] }
  0x39   : > { %722 = vrot.lane.b32.xlu1 %v2236_v30, %s2099_s21  ;;  %v393_v24 = vor.u32 %v2386_v41, %v390_v19  ;;  %v309_v62 = vld [vmem:[%s2217_s19 + $0x7c] sm:$0xf]  ;;  %v433_v63 = vrot.slane %v2386_v41, 1  ;;  %v616_v1 = vrot.slane %v2353_v56, 5  ;;  %v317_v5 = vmax.bf16 %v293_v60, %v285_v32 }
  0x3a   : > { %v359_v39 = vshrl.u32 %v331_v26, 16  ;;  %v399_v40 = vshll.u32 %v331_v26, 16  ;;  %v597_v34 = vor.u32 %v596_v59, %v2339_v50  ;;  %v325_v6 = vmax.bf16 %v309_v62, %v301_v61 }
  0x3b   : > { %v2419_v27 = vsel %vm2269_vm5, %v353_v47, %v393_v24  ;;  %v453_v9 = vrot.slane %v2386_v41, 5  ;;  %v2473_v50 = vcombine.low %v331_v26, %v331_v26  ;;  %v2523_v61 = vcombine.low %v2095_v0, %v2095_v0 }
  0x3c   : > { %744 = vrot.lane.b32.xlu0 %v628_v37, %s2100_s22  ;;  %v361_v42 = vrot.slane %v359_v39, 3  ;;  %v398_v43 = vrot.slane %v359_v39, 7  ;;  %v437_v8 = vrot.slane %v399_v40, 1  ;;  %v632_v56 = vsel %vm2202_vm2, %v597_v34, %v616_v1 }
  0x3d   : > { %726 = vrot.lane.b32.xlu1 %v2290_v10, %s2099_s21  ;;  %v333_v35 = vmax.bf16 %v325_v6, %v317_v5  ;;  %v455_v14 = vrot.slane %v399_v40, 5  ;;  %v521_v47 = vshrl.u32 %v2473_v50, 16  ;;  %v640_v1 = vshrl.u32 %v2523_v61, 16 }
  0x3e   : > { %v401_v51 = vor.u32 %v399_v40, %v398_v43 }
  0x3f   : > { %v2486_v19 = vcombine.low %v333_v35, %v333_v35  ;;  %v644_v6 = vrot.slane %v640_v1, 7 }
  0x40   : > { %748 = vrot.lane.b32.xlu0 %v2332_v45, %s2100_s22 }
  0x41   : > { %746 = vrot.lane.b32.xlu1 %v2336_v46, %s2100_s22  ;;  %v529_v28 = vshrl.u32 %v2486_v19, 16  ;;  %v569_v43 = vshll.u32 %v2486_v19, 16 }
  0x43   : > { %v602_v60 = vrot.slane %v569_v43, 1  ;;  %v619_v34 = vrot.slane %v569_v43, 5 }
  0x44   : > { %761 = vrot.lane.b32.xlu0 %v581_v15, %s2101_s23  ;;  %v300_v15 = vld [vmem:[%s2217_s19 + $0x58] sm:$0xf]  ;;  %s2105_s19 = smov 56  }
  0x45   : > { %750 = vrot.lane.b32.xlu1 %v2349_v53, %s2100_s22  ;;  %v324_v23 = vmax.bf16 %v308_v16, %v300_v15 }
  0x47   : > { %v332_v36 = vmax.bf16 %v324_v23, %v316_v22 }
  0x48   : > { %765 = vrot.lane.b32.xlu0 %v583_v25, %s2101_s23  ;;  %v394_v25 = vrot.slane %v2391_v17, 7 }
  0x49   : > { %763 = vrot.lane.b32.xlu1 %v2296_v11, %s2101_s23  ;;  %v2409_v11 = vshll.u32 %v2314_v31, 16  ;;  %v363_v48 = vshrl.u32 %v332_v36, 16  ;;  %v2437_v52 = vshll.u32 %v332_v36, 16 }
  0x4b   : > { %v397_v37 = vor.u32 %v2409_v11, %v394_v25  ;;  %v402_v54 = vrot.slane %v363_v48, 7  ;;  %v365_v57 = vrot.slane %v363_v48, 3  ;;  %v435_v13 = vrot.slane %v2409_v11, 1 }
  0x4c   : > { %777 = vrot.lane.b32.xlu0 %v2236_v30, %s2102_s9  ;;  %v454_v41 = vrot.slane %v2409_v11, 5  ;;  %v439_v16 = vrot.slane %v2437_v52, 1  ;;  %v456_v22 = vrot.slane %v2437_v52, 5  ;;  %v560_v25 = vrot.slane %v521_v47, 7 }
  0x4d   : > { %767 = vrot.lane.b32.xlu1 %v2406_v21, %s2101_s23  ;;  %v2428_v30 = vsel %vm2269_vm5, %v357_v29, %v397_v37  ;;  %v405_v58 = vor.u32 %v2437_v52, %v402_v54 }
  0x4e   : > { %v440_v24 = vor.u32 %v439_v16, %v363_v48 }
  0x50   : > { %781 = vrot.lane.b32.xlu0 %v2290_v10, %s2102_s9  ;;  %v1009_v10 = vsel %vm1007_vm6, %v2025_v49, 0 }
  0x51   : > { %779 = vrot.lane.b32.xlu1 %v2247_v38, %s2102_s9  ;;  %v2443_v38 = vsel %vm2269_vm5, %v361_v42, %v401_v51  ;;  %1941 = vmatpush3.bf16.msra.mxu0 %v1009_v10  ;;  %v568_v42 = vrot.slane %v529_v28, 7  ;;  %v531_v51 = vrot.slane %v529_v28, 3 }
  0x53   : > { %v571_v52 = vor.u32 %v569_v43, %v568_v42  ;;  %v337_v42 = vrot.slane %v2095_v0, 3  ;;  %v374_v43 = vrot.slane %v2095_v0, 7 }
  0x54   : > { %794 = vrot.lane.b32.xlu0 %v2336_v46, %s2103_s29  ;;  %v2455_v46 = vsel %vm2269_vm5, %v365_v57, %v405_v58 }
  0x55   : > { %783 = vrot.lane.b32.xlu1 %v2325_v44, %s2102_s9  ;;  %v587_v10 = vsel %vm2269_vm5, %v531_v51, %v571_v52 }
  0x58   : > { %664 = vrot.lane.b32.xlu0 %v2281_v2, %s2096_s13  ;;  %v434_v2 = vor.u32 %v433_v63, %v2375_v7  ;;  %v436_v7 = vor.u32 %v435_v13, %v2391_v17  ;;  %v603_v63 = vor.u32 %v602_v60, %v529_v28 }
  0x59   : > { %796 = vrot.lane.b32.xlu1 %v2332_v45, %s2103_s29  ;;  %v2470_v45 = vcombine.low %v332_v36, %v332_v36 }
  0x5a   : > { %v473_v17 = vsel %vm2202_vm2, %v436_v7, %v454_v41  ;;  %v635_v5 = vsel %vm2202_vm2, %v603_v63, %v619_v34 }
  0x5b   : > { %v525_v15 = vshrl.u32 %v2470_v45, 16  ;;  %v565_v11 = vshll.u32 %v2470_v45, 16 }
  0x5c   : > { %798 = vrot.lane.b32.xlu0 %v2349_v53, %s2103_s29  ;;  %v438_v53 = vor.u32 %v437_v8, %v359_v39  ;;  %v523_v39 = vrot.slane %v521_v47, 3  ;;  %v645_v8 = vshll.u32 %v2523_v61, 16 }
  0x5d   : > { %666 = vrot.lane.b32.xlu1 %v2314_v31, %s2096_s13  ;;  %v472_v31 = vsel %vm2202_vm2, %v434_v2, %v453_v9  ;;  %v564_v23 = vrot.slane %v525_v15, 7  ;;  %v527_v29 = vrot.slane %v525_v15, 3  ;;  %v618_v58 = vrot.slane %v565_v11, 5 }
  0x5e   : > { %v474_v20 = vsel %vm2202_vm2, %v438_v53, %v455_v14  ;;  %v642_v2 = vrot.slane %v640_v1, 3  ;;  %v647_v9 = vor.u32 %v645_v8, %v644_v6  ;;  %v650_v53 = vrot.slane %v645_v8, 1 }
  0x5f   : > { %v567_v37 = vor.u32 %v565_v11, %v564_v23  ;;  %v653_v7 = vrot.slane %v645_v8, 5 }
  0x60   : > { %668 = vrot.lane.b32.xlu0 %v331_v26, %s2096_s13  ;;  %v561_v26 = vshll.u32 %v2473_v50, 16 }
  0x61   : > { %800 = vrot.lane.b32.xlu1 %v632_v56, %s2103_s29  ;;  %v586_v48 = vsel %vm2269_vm5, %v527_v29, %v567_v37 }
  0x62   : > { %v563_v40 = vor.u32 %v561_v26, %v560_v25  ;;  %v598_v54 = vrot.slane %v561_v26, 1  ;;  %v617_v32 = vrot.slane %v561_v26, 5 }
  0x64   : > { %688 = vrot.lane.b32.xlu0 %v472_v31, %s2097_s15  ;;  %v585_v49 = vsel %vm2269_vm5, %v523_v39, %v563_v40  ;;  %v599_v59 = vor.u32 %v598_v54, %v521_v47 }
  0x65   : > { %670 = vrot.lane.b32.xlu1 %v332_v36, %s2096_s13  ;;  %v475_v36 = vsel %vm2202_vm2, %v440_v24, %v456_v22  ;;  %s2104_s13 = smov 48  }
  0x66   : > { %v633_v62 = vsel %vm2202_vm2, %v599_v59, %v617_v32 }
  0x68   : > { %692 = vrot.lane.b32.xlu0 %v474_v20, %s2097_s15 }
  0x69   : > { %690 = vrot.lane.b32.xlu1 %v473_v17, %s2097_s15 }
  0x6c   : > { %712 = vrot.lane.b32.xlu0 %v2406_v21, %s2098_s20  ;;  %v600_v21 = vrot.slane %v565_v11, 1 }
  0x6d   : > { %694 = vrot.lane.b32.xlu1 %v475_v36, %s2097_s15 }
  0x6e   : > { %v601_v57 = vor.u32 %v600_v21, %v525_v15 }
  0x70   : > { %716 = vrot.lane.b32.xlu0 %v586_v48, %s2098_s20 }
  0x71   : > { %714 = vrot.lane.b32.xlu1 %v585_v49, %s2098_s20 }
  0x74   : > { %728 = vrot.lane.b32.xlu0 %v2325_v44, %s2099_s21  ;;  %v634_v44 = vsel %vm2202_vm2, %v601_v57, %v618_v58 }
  0x75   : > { %718 = vrot.lane.b32.xlu1 %v587_v10, %s2098_s20 }
  0x78   : > { %732 = vrot.lane.b32.xlu0 %v2470_v45, %s2099_s21 }
  0x79   : > { %730 = vrot.lane.b32.xlu1 %v2473_v50, %s2099_s21 }
  0x7c   : > { %752 = vrot.lane.b32.xlu0 %v632_v56, %s2100_s22  ;;  %v2544_v56 = vsel %vm2269_vm5, %v642_v2, %v647_v9 }
  0x7d   : > { %734 = vrot.lane.b32.xlu1 %v2486_v19, %s2099_s21 }
  0x80   : > { %756 = vrot.lane.b32.xlu0 %v634_v44, %s2100_s22  ;;  %v657_v13 = vpop.permute.xlu0 %656 }
  0x81   : > { %754 = vrot.lane.b32.xlu1 %v633_v62, %s2100_s22 }
  0x84   : > { %769 = vrot.lane.b32.xlu0 %v585_v49, %s2101_s23  ;;  %v681_v35 = vpop.permute.xlu0 %680  ;;  %v2577_v49 = vsel %vm2269_vm5, %v337_v42, %v374_v43 }
  0x85   : > { %758 = vrot.lane.b32.xlu1 %v635_v5, %s2100_s22  ;;  %v813_v52 = vsel %vm810_vm7, %v2577_v49, %v657_v13 }
  0x88   : > { %773 = vrot.lane.b32.xlu0 %v587_v10, %s2101_s23 }
  0x89   : > { %771 = vrot.lane.b32.xlu1 %v586_v48, %s2101_s23 }
  0x8c   : > { %785 = vrot.lane.b32.xlu0 %v2473_v50, %s2102_s9  ;;  %v651_v50 = vor.u32 %v650_v53, %v640_v1 }
  0x8d   : > { %775 = vrot.lane.b32.xlu1 %v2544_v56, %s2101_s23 }
  0x90   : > { %789 = vrot.lane.b32.xlu0 %v2486_v19, %s2102_s9 }
  0x91   : > { %787 = vrot.lane.b32.xlu1 %v2470_v45, %s2102_s9  ;;  %v2565_v45 = vsel %vm2202_vm2, %v651_v50, %v653_v7 }
  0x93   : > { %v2554_v14 = vpop.permute.xlu1 %660  ;;  %v659_v31 = vpop.permute.xlu0 %658 }
  0x94   : > { %802 = vrot.lane.b32.xlu0 %v633_v62, %s2103_s29  ;;  %v816_v10 = vsel %vm810_vm7, %v2381_v12, %v659_v31  ;;  %v819_v13 = vsel %vm810_vm7, %v2368_v33, %v2554_v14 }
  0x95   : > { %791 = vrot.lane.b32.xlu1 %v2523_v61, %s2102_s9 }
  0x97   : > { %v2559_v41 = vpop.permute.xlu1 %662 }
  0x98   : > { %806 = vrot.lane.b32.xlu0 %v635_v5, %s2103_s29 }
  0x99   : > { %804 = vrot.lane.b32.xlu1 %v634_v44, %s2103_s29 }
  0x9a   : > { %v685_v15 = vpop.permute.xlu0 %684 }
  0x9b   : > { %v683_v16 = vpop.permute.xlu1 %682  ;;  %v841_v31 = vsel %vm835_vm8, %v819_v13, %v685_v15 }
  0x9c   : > { %1282 = vrot.lane.b32.xlu0 %v2095_v0, %s2097_s15  ;;  %v837_v0 = vsel %vm835_vm8, %v813_v52, %v681_v35  ;;  %v839_v54 = vsel %vm835_vm8, %v816_v10, %v683_v16  ;;  %v822_v35 = vsel %vm810_vm7, %v2397_v18, %v2559_v41 }
  0x9d   : > { %808 = vrot.lane.b32.xlu1 %v2565_v45, %s2103_s29 }
  0x9e   : > { %v705_v47 = vpop.permute.xlu0 %704 }
  0x9f   : > { %v687_v19 = vpop.permute.xlu1 %686  ;;  %v854_v58 = vsel %vm852_vm9, %v837_v0, %v705_v47 }
  0xa0   : > { %1305 = vrot.lane.b32.xlu0 %v2209_v4, %s2099_s21  ;;  %v843_v50 = vsel %vm835_vm8, %v822_v35, %v687_v19 }
  0xa1   : > { %1392 = vrot.lane.b32.xlu1 %v2544_v56, %s2104_s13  ;;  %v2674_v56 = vld [vmem:[%s3009_s3] ss:$0 sm:$0xff] }
  0xa2   : > { %v709_v20 = vpop.permute.xlu0 %708 }
  0xa3   : > { %v707_v17 = vpop.permute.xlu1 %706  ;;  %v858_v16 = vsel %vm852_vm9, %v841_v31, %v709_v20 }
  0xa4   : > { %v856_v59 = vsel %vm852_vm9, %v839_v54, %v707_v17 }
  0xa5   : > { %1408 = vrot.lane.b32.xlu1 %v2523_v61, %s2105_s19 }
  0xa6   : > { %v721_v22 = vpop.permute.xlu0 %720 }
  0xa7   : > { %v711_v23 = vpop.permute.xlu1 %710  ;;  %v871_v60 = vsel %vm869_vm10, %v854_v58, %v721_v22 }
  0xa8   : > { %v860_v47 = vsel %vm852_vm9, %v843_v50, %v711_v23 }
  0xaa   : > { %v725_v11 = vpop.permute.xlu0 %724 }
  0xab   : > { %v723_v24 = vpop.permute.xlu1 %722  ;;  %v875_v22 = vsel %vm869_vm10, %v858_v16, %v725_v11 }
  0xac   : > { %v873_v44 = vsel %vm869_vm10, %v856_v59, %v723_v24 }
  0xae   : > { %v745_v25 = vpop.permute.xlu0 %744 }
  0xaf   : > { %v727_v26 = vpop.permute.xlu1 %726  ;;  %v888_v12 = vsel %vm886_vm11, %v871_v60, %v745_v25 }
  0xb0   : > { %v877_v33 = vsel %vm869_vm10, %v860_v47, %v727_v26 }
  0xb2   : > { %v749_v28 = vpop.permute.xlu0 %748 }
  0xb3   : > { %v747_v29 = vpop.permute.xlu1 %746  ;;  %v892_v14 = vsel %vm886_vm11, %v875_v22, %v749_v28 }
  0xb4   : > { %v890_v62 = vsel %vm886_vm11, %v873_v44, %v747_v29 }
  0xb6   : > { %v762_v37 = vpop.permute.xlu0 %761 }
  0xb7   : > { %v751_v39 = vpop.permute.xlu1 %750  ;;  %v905_v63 = vsel %vm903_vm12, %v888_v12, %v762_v37 }
  0xb8   : > { %v894_v18 = vsel %vm886_vm11, %v877_v33, %v751_v39 }
  0xba   : > { %v766_v36 = vpop.permute.xlu0 %765 }
  0xbb   : > { %v764_v40 = vpop.permute.xlu1 %763  ;;  %v909_v41 = vsel %vm903_vm12, %v892_v14, %v766_v36 }
  0xbc   : > { %v907_v34 = vsel %vm903_vm12, %v890_v62, %v764_v40 }
  0xbe   : > { %v778_v48 = vpop.permute.xlu0 %777 }
  0xbf   : > { %v768_v4 = vpop.permute.xlu1 %767  ;;  %v922_v5 = vsel %vm920_vm13, %v905_v63, %v778_v48 }
  0xc0   : > { %v911_v15 = vsel %vm903_vm12, %v894_v18, %v768_v4 }
  0xc2   : > { %v782_v51 = vpop.permute.xlu0 %781 }
  0xc3   : > { %v780_v21 = vpop.permute.xlu1 %779  ;;  %v926_v20 = vsel %vm920_vm13, %v909_v41, %v782_v51 }
  0xc4   : > { %v924_v6 = vsel %vm920_vm13, %v907_v34, %v780_v21 }
  0xc6   : > { %v795_v57 = vpop.permute.xlu0 %794 }
  0xc7   : > { %v784_v32 = vpop.permute.xlu1 %783  ;;  %v939_v2 = vsel %vm937_vm14, %v922_v5, %v795_v57 }
  0xc8   : > { %v928_v23 = vsel %vm920_vm13, %v911_v15, %v784_v32 }
  0xca   : > { %v665_v1 = vpop.permute.xlu0 %664 }
  0xcb   : > { %v797_v8 = vpop.permute.xlu1 %796  ;;  %v825_v63 = vsel %vm810_vm7, %v2419_v27, %v665_v1 }
  0xcc   : > { %v941_v9 = vsel %vm937_vm14, %v924_v6, %v797_v8 }
  0xcd   : > { %v1871_v53 = vcombine.low %v939_v2, %v941_v9 }
  0xce   : > { %v799_v7 = vpop.permute.xlu0 %798 }
  0xcf   : > { %v667_v17 = vpop.permute.xlu1 %666  ;;  %1942 = vmatprep.mubr.msk.bf16.mxu0 %vm994_vm15, %v1871_v53  ;;  %v943_v25 = vsel %vm937_vm14, %v926_v20, %v799_v7 }
  0xd0   : > { %v828_v34 = vsel %vm810_vm7, %v2428_v30, %v667_v17 }
  0xd2   : > { %v669_v19 = vpop.permute.xlu0 %668 }
  0xd3   : > { %v801_v24 = vpop.permute.xlu1 %800  ;;  %v831_v27 = vsel %vm810_vm7, %v2443_v38, %v669_v19 }
  0xd4   : > { %v945_v11 = vsel %vm937_vm14, %v928_v23, %v801_v24 }
  0xd5   : > { %v1872_v29 = vcombine.low %v943_v25, %v945_v11 }
  0xd6   : > { %v689_v26 = vpop.permute.xlu0 %688 }
  0xd7   : > { %v671_v37 = vpop.permute.xlu1 %670  ;;  %1943 = vmatmul.mubr.msk.bf16.vlgmr.msra.gmra.mrb[0].mxu0 %vm994_vm15, %v1872_v29  ;;  %v845_v5 = vsel %vm835_vm8, %v825_v63, %v689_v26 }
  0xd8   : > { %v834_v30 = vsel %vm810_vm7, %v2455_v46, %v671_v37 }
  0xda   : > { %v693_v28 = vpop.permute.xlu0 %692 }
  0xdb   : > { %v691_v39 = vpop.permute.xlu1 %690  ;;  %v849_v50 = vsel %vm835_vm8, %v831_v27, %v693_v28 }
  0xdc   : > { %v847_v6 = vsel %vm835_vm8, %v828_v34, %v691_v39 }
  0xde   : > { %v713_v36 = vpop.permute.xlu0 %712 }
  0xdf   : > { %v695_v40 = vpop.permute.xlu1 %694  ;;  %v862_v8 = vsel %vm852_vm9, %v845_v5, %v713_v36 }
  0xe0   : > { %v851_v7 = vsel %vm835_vm8, %v834_v30, %v695_v40 }
  0xe2   : > { %v717_v42 = vpop.permute.xlu0 %716 }
  0xe3   : > { %v715_v43 = vpop.permute.xlu1 %714  ;;  %v866_v17 = vsel %vm852_vm9, %v849_v50, %v717_v42 }
  0xe4   : > { %v864_v2 = vsel %vm852_vm9, %v847_v6, %v715_v43 }
  0xe6   : > { %v729_v48 = vpop.permute.xlu0 %728 }
  0xe7   : > { %v719_v4 = vpop.permute.xlu1 %718  ;;  %v879_v35 = vsel %vm869_vm10, %v862_v8, %v729_v48 }
  0xe8   : > { %v868_v22 = vsel %vm852_vm9, %v851_v7, %v719_v4  ;;  %v2669_v4 = vld [vmem:[%s3008_s2] ss:$0 sm:$0xff] }
  0xea   : > { %v733_v51 = vpop.permute.xlu0 %732 }
  0xeb   : > { %v731_v52 = vpop.permute.xlu1 %730  ;;  %v883_v14 = vsel %vm869_vm10, %v866_v17, %v733_v51 }
  0xec   : > { %v881_v53 = vsel %vm869_vm10, %v864_v2, %v731_v52 }
  0xee   : > { %v753_v10 = vpop.permute.xlu0 %752 }
  0xef   : > { %v735_v21 = vpop.permute.xlu1 %734  ;;  %v896_v1 = vsel %vm886_vm11, %v879_v35, %v753_v10 }
  0xf0   : > { %v885_v18 = vsel %vm869_vm10, %v868_v22, %v735_v21 }
  0xf2   : > { %v757_v0 = vpop.permute.xlu0 %756 }
  0xf3   : > { %v755_v54 = vpop.permute.xlu1 %754  ;;  %v900_v19 = vsel %vm886_vm11, %v883_v14, %v757_v0 }
  0xf4   : > { %v898_v31 = vsel %vm886_vm11, %v881_v53, %v755_v54 }
  0xf6   : > { %v770_v57 = vpop.permute.xlu0 %769 }
  0xf7   : > { %v759_v58 = vpop.permute.xlu1 %758  ;;  %v913_v16 = vsel %vm903_vm12, %v896_v1, %v770_v57 }
  0xf8   : > { %v902_v20 = vsel %vm886_vm11, %v885_v18, %v759_v58 }
  0xfa   : > { %v774_v59 = vpop.permute.xlu0 %773 }
  0xfb   : > { %v772_v32 = vpop.permute.xlu1 %771  ;;  %v917_v25 = vsel %vm903_vm12, %v900_v19, %v774_v59 }
  0xfc   : > { %v915_v47 = vsel %vm903_vm12, %v898_v31, %v772_v32 }
  0xfe   : > { %v786_v60 = vpop.permute.xlu0 %785 }
  0xff   : > { %v776_v44 = vpop.permute.xlu1 %775  ;;  %v930_v38 = vsel %vm920_vm13, %v913_v16, %v786_v60 }
 0x100   : > { %v919_v11 = vsel %vm903_vm12, %v902_v20, %v776_v44 }
 0x102   : > { %v790_v12 = vpop.permute.xlu0 %789 }
 0x103   : > { %v788_v62 = vpop.permute.xlu1 %787  ;;  %v934_v29 = vsel %vm920_vm13, %v917_v25, %v790_v12 }
 0x104   : > { %v932_v46 = vsel %vm920_vm13, %v915_v47, %v788_v62 }
 0x106   : > { %v803_v9 = vpop.permute.xlu0 %802 }
 0x107   : > { %v792_v13 = vpop.permute.xlu1 %791  ;;  %v947_v41 = vsel %vm937_vm14, %v930_v38, %v803_v9 }
 0x108   : > { %v936_v26 = vsel %vm920_vm13, %v919_v11, %v792_v13 }
 0x10a   : > { %v807_v23 = vpop.permute.xlu0 %806 }
 0x10b   : > { %v805_v33 = vpop.permute.xlu1 %804  ;;  %v951_v28 = vsel %vm937_vm14, %v934_v29, %v807_v23 }
 0x10c   : > { %v949_v15 = vsel %vm937_vm14, %v932_v46, %v805_v33 }
 0x10d   : > { %v1873_v24 = vcombine.low %v947_v41, %v949_v15 }
 0x10e   : > { %v1283_v40 = vpop.permute.xlu0 %1282 }
 0x10f   : > { %v809_v37 = vpop.permute.xlu1 %808  ;;  %1946 = vmatprep.mubr.msk.bf16.mxu0 %vm994_vm15, %v1873_v24  ;;  %v1427_v42 = vsel %vm835_vm8, %v2577_v49, %v1283_v40 }
 0x110   : > { %v953_v39 = vsel %vm937_vm14, %v936_v26, %v809_v37 }
 0x111   : > { %v1874_v36 = vcombine.low %v951_v28, %v953_v39 }
 0x112   : > { %v1306_v43 = vpop.permute.xlu0 %1305 }
 0x113   : > { %1947 = vmatmul.mubr.msk.bf16.gmra.mrb[4].mxu0 %vm994_vm15, %v1874_v36  ;;  %v2664_v48 = vsel %vm869_vm10, %v1427_v42, %v1306_v43 }
 0x1aa   : > { %v1944_v51 = vpop.f32.mrb[0].mxu0 }
 0x1ab   : > { %v1085_v61 = vmul.f32 %v1944_v51, %v2669_v4  ;;  %v1045_v52 = vpop.f32.mrb[1].mxu0 }
 0x1ac   : > { %v1083_v49 = vmul.f32 %v2669_v4, %v1045_v52  ;;  %v1945_v10 = vpop.f32.mrb[2].mxu0 }
 0x1ad   : > { %v1100_v21 = vadd.f32 %v2674_v56, %v1085_v61  ;;  %v1086_v0 = vmul.f32 %v1945_v10, %v2669_v4  ;;  %v1048_v54 = vpop.f32.mrb[3].mxu0 }
 0x1ae   : > { %v1098_v57 = vadd.f32 %v2674_v56, %v1083_v49  ;;  %v1084_v63 = vmul.f32 %v2669_v4, %v1048_v54 }
 0x1af   : > { %v1108_v58 = vmul.f32 0.01, %v1100_v21  ;;  %v1101_v59 = vadd.f32 %v2674_v56, %v1086_v0 }
 0x1b0   : > { %v1106_v32 = vmul.f32 0.01, %v1098_v57  ;;  %v1099_v6 = vadd.f32 %v2674_v56, %v1084_v63 }
 0x1b1   : > { %v1116_v60 = vmax.f32 %v1100_v21, %v1108_v58  ;;  %v1109_v62 = vmul.f32 0.01, %v1101_v59 }
 0x1b2   : > { %v1114_v12 = vmax.f32 %v1098_v57, %v1106_v32  ;;  %v1107_v2 = vmul.f32 0.01, %v1099_v6 }
 0x1b3   : > { %v1914_v44 = vpack.c.bf16 %v1116_v60, %v1116_v60  ;;  %v1117_v5 = vmax.f32 %v1101_v59, %v1109_v62 }
 0x1b4   : > { %v1912_v34 = vpack.c.bf16 %v1114_v12, %v1114_v12  ;;  %v1115_v13 = vmax.f32 %v1099_v6, %v1107_v2 }
 0x1b5   : > { %1349 = vrot.lane.b32.xlu0 %v1914_v44, %s2103_s29  ;;  %1288 = vrot.lane.b32.xlu1 %v1914_v44, %s2097_s15  ;;  %v1915_v8 = vpack.c.bf16 %v1117_v5, %v1117_v5  ;;  %v1189_v9 = vshll.u32 %v1914_v44, 16  ;;  %v1154_v35 = vshrl.u32 %v1914_v44, 16 }
 0x1b6   : > { %v2692_v27 = vpack.c.bf16 %v1115_v13, %v1115_v13  ;;  %v1146_v16 = vshrl.u32 %v1912_v34, 16  ;;  %v1181_v47 = vshll.u32 %v1912_v34, 16  ;;  %v2026_v13 = vld [vmem:[%s3010_s4] sm:$0xff]  }
 0x1b7   : > { %v1226_v53 = vrot.slane %v1189_v9, 1  ;;  %v1188_v1 = vrot.slane %v1154_v35, 7  ;;  %v1245_v31 = vrot.slane %v1189_v9, 5  ;;  %v1156_v17 = vrot.slane %v1154_v35, 3  ;;  %1950 = vmatprep.subr.bf16.mxu1 %v2026_v13 }
 0x1b8   : > { %v1222_v38 = vrot.slane %v1181_v47, 1  ;;  %v1180_v46 = vrot.slane %v1146_v16, 7  ;;  %v1243_v18 = vrot.slane %v1181_v47, 5  ;;  %v1148_v41 = vrot.slane %v1146_v16, 3  ;;  %1951 = vmatpush3.bf16.msra.mxu1 %v2026_v13 }
 0x1b9   : > { %1396 = vrot.lane.b32.xlu1 %v1914_v44, %s2105_s19  ;;  %1345 = vrot.lane.b32.xlu0 %v1912_v34, %s2103_s29  ;;  %v1227_v30 = vor.u32 %v1226_v53, %v1154_v35  ;;  %v1191_v7 = vor.u32 %v1189_v9, %v1188_v1  ;;  %v1158_v29 = vshrl.u32 %v1915_v8, 16  ;;  %v1193_v61 = vshll.u32 %v1915_v8, 16 }
 0x1ba   : > { %v1223_v33 = vor.u32 %v1222_v38, %v1146_v16  ;;  %v1183_v14 = vor.u32 %v1181_v47, %v1180_v46  ;;  %v1185_v59 = vshll.u32 %v2692_v27, 16  ;;  %v1150_v60 = vshrl.u32 %v2692_v27, 16 }
 0x1bb   : > { %v1259_v50 = vsel %vm2202_vm2, %v1227_v30, %v1245_v31  ;;  %v2705_v22 = vsel %vm2269_vm5, %v1156_v17, %v1191_v7  ;;  %v1192_v51 = vrot.slane %v1158_v29, 7  ;;  %v1228_v21 = vrot.slane %v1193_v61, 1  ;;  %v2027_v30 = vld [vmem:[%s3010_s4 + $0x8] sm:$0xff]   ;;  %v2029_v17 = vld [vmem:[%s3010_s4 + $0x18] sm:$0xff]  }
 0x1bc   : > { %v1257_v15 = vsel %vm2202_vm2, %v1223_v33, %v1243_v18  ;;  %v2717_v19 = vsel %vm2269_vm5, %v1148_v41, %v1183_v14  ;;  %v1160_v0 = vrot.slane %v1158_v29, 3  ;;  %v1224_v44 = vrot.slane %v1185_v59, 1  ;;  %1952 = vmatprep.subr.bf16.mxu1 %v2027_v30 }
 0x1bd   : > { %1284 = vrot.lane.b32.xlu1 %v1912_v34, %s2097_s15  ;;  %1398 = vrot.lane.b32.xlu0 %v1915_v8, %s2105_s19  ;;  %v1195_v10 = vor.u32 %v1193_v61, %v1192_v51  ;;  %v1184_v63 = vrot.slane %v1150_v60, 7  ;;  %v1244_v34 = vrot.slane %v1185_v59, 5 }
 0x1be   : > { %v1225_v62 = vor.u32 %v1224_v44, %v1150_v60  ;;  %1953 = vmatpush3.bf16.msra.mxu1 %v2027_v30 }
 0x1bf   : > { %v2735_v54 = vsel %vm2269_vm5, %v1160_v0, %v1195_v10  ;;  %v1187_v6 = vor.u32 %v1185_v59, %v1184_v63 }
 0x1c0   : > { %v1258_v5 = vsel %vm2202_vm2, %v1225_v62, %v1244_v34 }
 0x1c1   : > { %1290 = vrot.lane.b32.xlu0 %v1915_v8, %s2097_s15  ;;  %1351 = vrot.lane.b32.xlu1 %v1915_v8, %s2103_s29  ;;  %v1152_v8 = vrot.slane %v1150_v60, 3 }
 0x1c3   : > { %v2757_v9 = vsel %vm2269_vm5, %v1152_v8, %v1187_v6 }
 0x1c5   : > { %1347 = vrot.lane.b32.xlu1 %v2692_v27, %s2103_s29  ;;  %1286 = vrot.lane.b32.xlu0 %v2692_v27, %s2097_s15 }
 0x1c9   : > { %1311 = vrot.lane.b32.xlu1 %v1259_v50, %s2099_s21  ;;  %1394 = vrot.lane.b32.xlu0 %v2692_v27, %s2105_s19 }
 0x1cd   : > { %1380 = vrot.lane.b32.xlu1 %v2705_v22, %s2104_s13  ;;  %1333 = vrot.lane.b32.xlu0 %v2705_v22, %s2101_s23 }
 0x1d1   : > { %1412 = vrot.lane.b32.xlu1 %v1259_v50, %s2106_s14  ;;  %1366 = vrot.lane.b32.xlu0 %v1259_v50, %s2107_s16  ;;  %v2028_v50 = vld [vmem:[%s3010_s4 + $0x10] sm:$0xff]  }
 0x1d2   : > { %1954 = vmatprep.subr.bf16.mxu1 %v2028_v50 }
 0x1d3   : > { %1955 = vmatpush3.bf16.msra.mxu1 %v2028_v50 }
 0x1d4   : > { %1956 = vmatprep.subr.bf16.mxu1 %v2029_v17 }
 0x1d5   : > { %1307 = vrot.lane.b32.xlu1 %v1257_v15, %s2099_s21  ;;  %1329 = vrot.lane.b32.xlu0 %v2717_v19, %s2101_s23 }
 0x1d7   : > { %1957 = vmatpush3.bf16.msra.mxu1 %v2029_v17 }
 0x1d9   : > { %1362 = vrot.lane.b32.xlu0 %v1257_v15, %s2107_s16  ;;  %v2030_v15 = vld [vmem:[%s3010_s4 + $0x20] ss:$0 sps:$4 sm:$0xff]  }
 0x1da   : > { %1969 = vmatprep.subr.msk.bf16.mxu1 %vm465_vm0, %v2030_v15 }
 0x1e6   : > { %v1948_v20 = vpop.f32.mrb[4].mxu0 }
 0x1e7   : > { %v1089_v23 = vmul.f32 %v1948_v20, %v2669_v4  ;;  %v1061_v24 = vpop.f32.mrb[5].mxu0 }
 0x1e8   : > { %v1087_v25 = vmul.f32 %v2669_v4, %v1061_v24  ;;  %v1949_v11 = vpop.f32.mrb[6].mxu0 }
 0x1e9   : > { %v1104_v26 = vadd.f32 %v2674_v56, %v1089_v23  ;;  %v1090_v37 = vmul.f32 %v1949_v11, %v2669_v4  ;;  %v1064_v28 = vpop.f32.mrb[7].mxu0  ;;  %v2789_v23 = vpop.permute.xlu1 %1392 }
 0x1ea   : > { %v1102_v39 = vadd.f32 %v2674_v56, %v1087_v25  ;;  %v1088_v36 = vmul.f32 %v2669_v4, %v1064_v28  ;;  %v1229_v4 = vor.u32 %v1228_v21, %v1158_v29  ;;  %v1636_v29 = vsel %vm465_vm0, %v2030_v15, 0 }
 0x1eb   : > { %v1112_v40 = vmul.f32 0.01, %v1104_v26  ;;  %v1105_v42 = vadd.f32 %v2674_v56, %v1090_v37  ;;  %1959 = vmatpush3.bf16.msra.mxu1 %v1636_v29  ;;  %vm1497_vm0 = vcmask 326656  }
 0x1ec   : > { %v1103_v43 = vadd.f32 %v2674_v56, %v1088_v36  ;;  %v1246_v56 = vrot.slane %v1193_v61, 5  ;;  %v1110_v57 = vmul.f32 0.01, %v1102_v39 }
 0x1ed   : > { %v1120_v52 = vmax.f32 %v1104_v26, %v1112_v40  ;;  %v1113_v2 = vmul.f32 0.01, %v1105_v42 }
 0x1ee   : > { %v1260_v58 = vsel %vm2202_vm2, %v1229_v4, %v1246_v56  ;;  %v1118_v32 = vmax.f32 %v1102_v39, %v1110_v57  ;;  %v1111_v53 = vmul.f32 0.01, %v1103_v43  ;;  %v2802_v39 = vpop.permute.xlu1 %1408 }
 0x1ef   : > { %v1918_v49 = vpack.c.bf16 %v1120_v52, %v1120_v52  ;;  %v1121_v35 = vmax.f32 %v1105_v42, %v1113_v2 }
 0x1f0   : > { %v1916_v12 = vpack.c.bf16 %v1118_v32, %v1118_v32  ;;  %v1119_v31 = vmax.f32 %v1103_v43, %v1111_v53 }
 0x1f1   : > { %1357 = vrot.lane.b32.xlu0 %v1918_v49, %s2103_s29  ;;  %1296 = vrot.lane.b32.xlu1 %v1918_v49, %s2097_s15  ;;  %v1205_v27 = vshll.u32 %v1918_v49, 16  ;;  %v1919_v1 = vpack.c.bf16 %v1121_v35, %v1121_v35  ;;  %v1170_v7 = vshrl.u32 %v1918_v49, 16 }
 0x1f2   : > { %v1917_v47 = vpack.c.bf16 %v1119_v31, %v1119_v31  ;;  %v1162_v41 = vshrl.u32 %v1916_v12, 16  ;;  %v1197_v11 = vshll.u32 %v1916_v12, 16 }
 0x1f3   : > { %v1234_v16 = vrot.slane %v1205_v27, 1  ;;  %v1204_v46 = vrot.slane %v1170_v7, 7  ;;  %v1249_v33 = vrot.slane %v1205_v27, 5  ;;  %v1172_v20 = vrot.slane %v1170_v7, 3 }
 0x1f4   : > { %v1196_v25 = vrot.slane %v1162_v41, 7  ;;  %v1230_v37 = vrot.slane %v1197_v11, 1  ;;  %v1266_v28 = vshrl.u32 %v1919_v1, 16  ;;  %v1164_v36 = vrot.slane %v1162_v41, 3 }
 0x1f5   : > { %1382 = vrot.lane.b32.xlu0 %v2735_v54, %s2104_s13  ;;  %1404 = vrot.lane.b32.xlu1 %v1918_v49, %s2105_s19  ;;  %v1235_v38 = vor.u32 %v1234_v16, %v1170_v7  ;;  %v1207_v18 = vor.u32 %v1205_v27, %v1204_v46  ;;  %v1201_v51 = vshll.u32 %v1917_v47, 16  ;;  %v1247_v61 = vrot.slane %v1197_v11, 5 }
 0x1f6   : > { %v1199_v26 = vor.u32 %v1197_v11, %v1196_v25  ;;  %v1231_v42 = vor.u32 %v1230_v37, %v1162_v41  ;;  %v1270_v43 = vrot.slane %v1266_v28, 7  ;;  %v1271_v52 = vshll.u32 %v1919_v1, 16 }
 0x1f7   : > { %v1263_v14 = vsel %vm2202_vm2, %v1235_v38, %v1249_v33  ;;  %v2793_v24 = vsel %vm2269_vm5, %v1172_v20, %v1207_v18  ;;  %v1166_v4 = vshrl.u32 %v1917_v47, 16  ;;  %v1232_v56 = vrot.slane %v1201_v51, 1 }
 0x1f8   : > { %v2806_v40 = vsel %vm2269_vm5, %v1164_v36, %v1199_v26  ;;  %v1261_v21 = vsel %vm2202_vm2, %v1231_v42, %v1247_v61  ;;  %v1273_v0 = vor.u32 %v1271_v52, %v1270_v43  ;;  %v1268_v57 = vrot.slane %v1266_v28, 3 }
 0x1f9   : > { %1414 = vrot.lane.b32.xlu0 %v1260_v58, %s2106_s14  ;;  %1335 = vrot.lane.b32.xlu1 %v2735_v54, %s2101_s23  ;;  %v1233_v60 = vor.u32 %v1232_v56, %v1166_v4  ;;  %v1276_v44 = vrot.slane %v1271_v52, 1  ;;  %v1248_v62 = vrot.slane %v1201_v51, 5  ;;  %v1279_v2 = vrot.slane %v1271_v52, 5 }
 0x1fa   : > { %v1275_v32 = vsel %vm2269_vm5, %v1268_v57, %v1273_v0  ;;  %v1168_v13 = vrot.slane %v1166_v4, 3 }
 0x1fb   : > { %v1277_v6 = vor.u32 %v1276_v44, %v1266_v28 }
 0x1fd   : > { %1313 = vrot.lane.b32.xlu0 %v1260_v58, %s2099_s21  ;;  %1368 = vrot.lane.b32.xlu1 %v1260_v58, %s2107_s16  ;;  %v1281_v30 = vsel %vm2202_vm2, %v1277_v6, %v1279_v2 }
 0x201   : > { %1353 = vrot.lane.b32.xlu0 %v1916_v12, %s2103_s29  ;;  %1400 = vrot.lane.b32.xlu1 %v1916_v12, %s2105_s19 }
 0x205   : > { %1309 = vrot.lane.b32.xlu0 %v1258_v5, %s2099_s21  ;;  %1292 = vrot.lane.b32.xlu1 %v1916_v12, %s2097_s15  ;;  %v1200_v12 = vrot.slane %v1166_v4, 7 }
 0x207   : > { %v1203_v8 = vor.u32 %v1201_v51, %v1200_v12 }
 0x209   : > { %1378 = vrot.lane.b32.xlu0 %v2757_v9, %s2104_s13  ;;  %1331 = vrot.lane.b32.xlu1 %v2757_v9, %s2101_s23 }
 0x20d   : > { %1410 = vrot.lane.b32.xlu0 %v1258_v5, %s2106_s14  ;;  %1364 = vrot.lane.b32.xlu1 %v1258_v5, %s2107_s16  ;;  %v1262_v5 = vsel %vm2202_vm2, %v1233_v60, %v1248_v62  ;;  %vm1531_vm2 = vcmask 457728  }
 0x211   : > { %1406 = vrot.lane.b32.xlu0 %v1919_v1, %s2105_s19  ;;  %1359 = vrot.lane.b32.xlu1 %v1919_v1, %s2103_s29  ;;  %v2840_v1 = vsel %vm2269_vm5, %v1168_v13, %v1203_v8 }
 0x215   : > { %1355 = vrot.lane.b32.xlu1 %v1917_v47, %s2103_s29  ;;  %1294 = vrot.lane.b32.xlu0 %v1917_v47, %s2097_s15 }
 0x219   : > { %1319 = vrot.lane.b32.xlu1 %v1263_v14, %s2099_s21  ;;  %1402 = vrot.lane.b32.xlu0 %v1917_v47, %s2105_s19 }
 0x21d   : > { %1388 = vrot.lane.b32.xlu1 %v2793_v24, %s2104_s13  ;;  %1341 = vrot.lane.b32.xlu0 %v2793_v24, %s2101_s23 }
 0x221   : > { %1420 = vrot.lane.b32.xlu1 %v1263_v14, %s2106_s14  ;;  %1374 = vrot.lane.b32.xlu0 %v1263_v14, %s2107_s16 }
 0x225   : > { %1384 = vrot.lane.b32.xlu1 %v2806_v40, %s2104_s13  ;;  %1337 = vrot.lane.b32.xlu0 %v2806_v40, %s2101_s23 }
 0x227   : > { %v2812_v49 = vpop.permute.xlu0 %1349  ;;  %v1289_v10 = vpop.permute.xlu1 %1288 }
 0x228   : > { %v1436_v3 = vsel %vm835_vm8, %v2705_v22, %v1289_v10 }
 0x229   : > { %1416 = vrot.lane.b32.xlu1 %v1261_v21, %s2106_s14  ;;  %1370 = vrot.lane.b32.xlu0 %v1261_v21, %s2107_s16 }
 0x22b   : > { %v2818_v58 = vpop.permute.xlu1 %1396  ;;  %v2820_v59 = vpop.permute.xlu0 %1345 }
 0x22d   : > { %1315 = vrot.lane.b32.xlu1 %v1261_v21, %s2099_s21  ;;  %1390 = vrot.lane.b32.xlu0 %v1275_v32, %s2104_s13 }
 0x22f   : > { %v1285_v63 = vpop.permute.xlu1 %1284  ;;  %v2826_v34 = vpop.permute.xlu0 %1398 }
 0x230   : > { %v1430_v61 = vsel %vm835_vm8, %v2717_v19, %v1285_v63 }
 0x231   : > { %1343 = vrot.lane.b32.xlu1 %v1275_v32, %s2101_s23  ;;  %1317 = vrot.lane.b32.xlu0 %v1262_v5, %s2099_s21 }
 0x233   : > { %v1291_v35 = vpop.permute.xlu0 %1290  ;;  %v1352_v53 = vpop.permute.xlu1 %1351 }
 0x234   : > { %v2834_v27 = vsel %vm835_vm8, %v2735_v54, %v1291_v35 }
 0x235   : > { %1376 = vrot.lane.b32.xlu1 %v1281_v30, %s2107_s16  ;;  %1386 = vrot.lane.b32.xlu0 %v2840_v1, %s2104_s13  ;;  %s269_s13 = sand.u32 1, %s2085_s25  }
 0x236   : > { %s1859_s19 = sshll.u32 %s269_s13, 3  ;;  %s1783_s20 = scalar_lea.sflag [#allocation3], %s269_s13 }
 0x237   : > { %v1348_v31 = vpop.permute.xlu1 %1347  ;;  %v1287_v50 = vpop.permute.xlu0 %1286 }
 0x238   : > { %v1433_v7 = vsel %vm835_vm8, %v2757_v9, %v1287_v50 }
 0x239   : > { %1418 = vrot.lane.b32.xlu0 %v1262_v5, %s2106_s14  ;;  %1339 = vrot.lane.b32.xlu1 %v2840_v1, %s2101_s23 }
 0x23b   : > { %v1312_v55 = vpop.permute.xlu1 %1311  ;;  %v1395_v16 = vpop.permute.xlu0 %1394 }
 0x23c   : > { %v1456_v54 = vsel %vm869_vm10, %v1436_v3, %v1312_v55 }
 0x23d   : > { %1422 = vrot.lane.b32.xlu0 %v1281_v30, %s2106_s14  ;;  %1372 = vrot.lane.b32.xlu1 %v1262_v5, %s2107_s16  ;;  %s271_s16 = scalar_lea.vmem [#allocation2], %s1859_s19 }
 0x23e   : > { %s1796_s8 = sshll.u32 %s271_s16, 4  ;;  %s2965_s8 = int_to_ptr.vmem [resolvable:$true] %s1796_s8 }
 0x23f   : > { %v1334_v9 = vpop.permute.xlu0 %1333  ;;  %v1381_v47 = vpop.permute.xlu1 %1380  ;;  %s2031_s22 = scalar_lea.vmem %s2965_s8, 128 }
 0x240   : > { %p2032_p11 = scmp.ne.s32.totalorder %s2965_s8, %s2031_s22 }
 0x241   : > { %1424 = vrot.lane.b32.xlu1 %v2565_v45, %s2106_s14  ;;  %s1908_s14 = sshll.u32 %s2170_s28, 7  ;;  %s2108_s28 = smov [#allocation2]  }
 0x242   : > { %s2963_s18 = scalar_lea.hbm %s3013_s7, %s1908_s14  ;;  %p2033_p12 = pnand %p2032_p11, %p2187_p5 }
 0x243   : > { %v1367_v17 = vpop.permute.xlu0 %1366  ;;  %v1413_v38 = vpop.permute.xlu1 %1412  ;;  %s2035_s15 = sshll.u32 %s2108_s28, 4  ;;  %s2036_s15 = int_to_ptr.vmem [resolvable:$false] %s2035_s15 }
 0x244   : > { %p2034_p13 = pneg %p2033_p12  ;;  %s2037_s21 = scalar_lea.vmem %s2036_s15, 256 }
 0x245   : > { %p2038_p0 = scmp.lt.s32.totalorder %s2965_s8, %s2036_s15  ;;  %p2039_p1 = scmp.lt.s32.totalorder %s2037_s21, %s2031_s22 }
 0x247   : > { %v1330_v46 = vpop.permute.xlu0 %1329  ;;  %v1308_v33 = vpop.permute.xlu1 %1307  ;;  %p2040_p2 = por %p2039_p1, %p2038_p0 }
 0x248   : > { %v1466_v52 = vsel %vm903_vm12, %v2664_v48, %v1330_v46  ;;  %v1452_v10 = vsel %vm869_vm10, %v1430_v61, %v1308_v33 }
 0x249   : > { %v1482_v56 = vsel %vm937_vm14, %v1466_v52, %v2820_v59  ;;  %p2041_p3 = pnand %p2040_p2, %p2034_p13 }
 0x24b   : > { %v1363_v14 = vpop.permute.xlu0 %1362 }
 0x24c   : > { %v1499_v57 = vsel %vm1497_vm0, %v1482_v56, %v1363_v14 }
 0x263   : > { %v2857_v18 = vpop.permute.xlu0 %1357  ;;  %v2859_v22 = vpop.permute.xlu1 %1296 }
 0x267   : > { %v1383_v41 = vpop.permute.xlu0 %1382  ;;  %v2861_v15 = vpop.permute.xlu1 %1404 }
 0x26b   : > { %v1415_v20 = vpop.permute.xlu0 %1414  ;;  %v1336_v25 = vpop.permute.xlu1 %1335 }
 0x26c   : > { %v1472_v11 = vsel %vm903_vm12, %v1456_v54, %v1336_v25 }
 0x26d   : > { %v1488_v45 = vsel %vm937_vm14, %v1472_v11, %v1352_v53 }
 0x26f   : > { %v2865_v29 = vpop.permute.xlu0 %1313  ;;  %v1369_v26 = vpop.permute.xlu1 %1368 }
 0x273   : > { %v2867_v37 = vpop.permute.xlu0 %1353  ;;  %v1401_v28 = vpop.permute.xlu1 %1400 }
 0x277   : > { %v1310_v36 = vpop.permute.xlu0 %1309  ;;  %v2869_v42 = vpop.permute.xlu1 %1292 }
 0x278   : > { %v1454_v43 = vsel %vm869_vm10, %v1433_v7, %v1310_v36 }
 0x279   : > { %v1470_v51 = vsel %vm903_vm12, %v1454_v43, %v1334_v9 }
 0x27b   : > { %v1379_v21 = vpop.permute.xlu0 %1378  ;;  %v1332_v0 = vpop.permute.xlu1 %1331 }
 0x27c   : > { %v1468_v4 = vsel %vm903_vm12, %v1452_v10, %v1332_v0  ;;  %v1516_v32 = vsel %vm1514_vm1, %v1499_v57, %v1379_v21  ;;  %v1458_v10 = vsel %vm869_vm10, %v2834_v27, %v2865_v29  ;;  %v1442_v21 = vsel %vm835_vm8, %v2806_v40, %v2869_v42 }
 0x27d   : > { %v1484_v60 = vsel %vm937_vm14, %v1468_v4, %v1348_v31  ;;  %v1533_v62 = vsel %vm1531_vm2, %v1516_v32, %v1395_v16  ;;  %v1505_v16 = vsel %vm1497_vm0, %v1488_v45, %v1369_v26 }
 0x27f   : > { %v1411_v19 = vpop.permute.xlu0 %1410  ;;  %v1365_v48 = vpop.permute.xlu1 %1364 }
 0x280   : > { %v1501_v44 = vsel %vm1497_vm0, %v1484_v60, %v1365_v48  ;;  %v1550_v59 = vsel %vm1548_vm3, %v1533_v62, %v1411_v19 }
 0x281   : > { %v1518_v12 = vsel %vm1514_vm1, %v1501_v44, %v1381_v47 }
 0x282   : > { %v1535_v63 = vsel %vm1531_vm2, %v1518_v12, %v2818_v58  ;;  %v1486_v58 = vsel %vm937_vm14, %v1470_v51, %v2812_v49 }
 0x283   : > { %v2890_v5 = vpop.permute.xlu0 %1406  ;;  %v1360_v6 = vpop.permute.xlu1 %1359  ;;  %v1552_v8 = vsel %vm1548_vm3, %v1535_v63, %v1413_v38  ;;  %v1503_v7 = vsel %vm1497_vm0, %v1486_v58, %v1367_v17 }
 0x284   : > { %v1892_v2 = vcombine.low %v1550_v59, %v1552_v8  ;;  %v1520_v54 = vsel %vm1514_vm1, %v1503_v7, %v1383_v41 }
 0x285   : > { %v1537_v46 = vsel %vm1531_vm2, %v1520_v54, %v2826_v34 }
 0x286   : > { %1960 = vmatprep.mubr.msk.bf16.mxu1 %vm1621_vm4, %v1892_v2  ;;  %v1554_v49 = vsel %vm1548_vm3, %v1537_v46, %v1415_v20 }
 0x287   : > { %v1356_v13 = vpop.permute.xlu1 %1355  ;;  %v1295_v35 = vpop.permute.xlu0 %1294 }
 0x288   : > { %v1445_v26 = vsel %vm835_vm8, %v2840_v1, %v1295_v35 }
 0x28b   : > { %v1320_v53 = vpop.permute.xlu1 %1319  ;;  %v1403_v30 = vpop.permute.xlu0 %1402 }
 0x28f   : > { %v1389_v31 = vpop.permute.xlu1 %1388  ;;  %v1342_v50 = vpop.permute.xlu0 %1341 }
 0x293   : > { %v1421_v3 = vpop.permute.xlu1 %1420  ;;  %v1375_v55 = vpop.permute.xlu0 %1374 }
 0x297   : > { %v1385_v9 = vpop.permute.xlu1 %1384  ;;  %v1338_v47 = vpop.permute.xlu0 %1337 }
 0x298   : > { %v1522_v38 = vsel %vm1514_vm1, %v1505_v16, %v1385_v9  ;;  %v1474_v0 = vsel %vm903_vm12, %v1458_v10, %v1338_v47 }
 0x299   : > { %v1539_v33 = vsel %vm1531_vm2, %v1522_v38, %v1401_v28  ;;  %v1448_v28 = vsel %vm835_vm8, %v2793_v24, %v2859_v22  ;;  %v1490_v27 = vsel %vm937_vm14, %v1474_v0, %v2867_v37 }
 0x29a   : > { %v1464_v52 = vsel %vm869_vm10, %v1448_v28, %v1320_v53 }
 0x29b   : > { %v1417_v14 = vpop.permute.xlu1 %1416  ;;  %v1371_v25 = vpop.permute.xlu0 %1370 }
 0x29c   : > { %v1556_v17 = vsel %vm1548_vm3, %v1539_v33, %v1417_v14  ;;  %v1507_v42 = vsel %vm1497_vm0, %v1490_v27, %v1371_v25 }
 0x29d   : > { %v1893_v11 = vcombine.low %v1554_v49, %v1556_v17 }
 0x29f   : > { %1961 = vmatmul.mubr.msk.bf16.vlgmr.msra.gmra.mrb[0].mxu1 %vm1621_vm4, %v1893_v11  ;;  %v1316_v41 = vpop.permute.xlu1 %1315  ;;  %v1391_v45 = vpop.permute.xlu0 %1390 }
 0x2a0   : > { %v1460_v22 = vsel %vm869_vm10, %v1442_v21, %v1316_v41 }
 0x2a3   : > { %v1344_v36 = vpop.permute.xlu1 %1343  ;;  %v1318_v43 = vpop.permute.xlu0 %1317 }
 0x2a4   : > { %v1462_v34 = vsel %vm869_vm10, %v1445_v26, %v1318_v43  ;;  %v1480_v1 = vsel %vm903_vm12, %v1464_v52, %v1344_v36 }
 0x2a5   : > { %v1478_v20 = vsel %vm903_vm12, %v1462_v34, %v1342_v50  ;;  %v1496_v57 = vsel %vm937_vm14, %v1480_v1, %v1360_v6 }
 0x2a6   : > { %v1494_v24 = vsel %vm937_vm14, %v1478_v20, %v2857_v18 }
 0x2a7   : > { %v1377_v51 = vpop.permute.xlu1 %1376  ;;  %v1387_v61 = vpop.permute.xlu0 %1386  ;;  %v1511_v40 = vsel %vm1497_vm0, %v1494_v24, %v1375_v55 }
 0x2a8   : > { %v1513_v29 = vsel %vm1497_vm0, %v1496_v57, %v1377_v51  ;;  %v1524_v19 = vsel %vm1514_vm1, %v1507_v42, %v1387_v61  ;;  %v1528_v44 = vsel %vm1514_vm1, %v1511_v40, %v1391_v45 }
 0x2a9   : > { %v1530_v48 = vsel %vm1514_vm1, %v1513_v29, %v2789_v23  ;;  %v1541_v63 = vsel %vm1531_vm2, %v1524_v19, %v1403_v30  ;;  %v1545_v8 = vsel %vm1531_vm2, %v1528_v44, %v2890_v5 }
 0x2aa   : > { %v1547_v23 = vsel %vm1531_vm2, %v1530_v48, %v2802_v39  ;;  %v1906_v39 = vld [vmem:[%s3012_s6] ss:$0 sm:$0xff] }
 0x2ab   : > { %v1419_v4 = vpop.permute.xlu0 %1418  ;;  %v1340_v56 = vpop.permute.xlu1 %1339 }
 0x2ac   : > { %v1476_v32 = vsel %vm903_vm12, %v1460_v22, %v1340_v56  ;;  %v1558_v6 = vsel %vm1548_vm3, %v1541_v63, %v1419_v4 }
 0x2ad   : > { %v1492_v18 = vsel %vm937_vm14, %v1476_v32, %v1356_v13 }
 0x2af   : > { %v1373_v60 = vpop.permute.xlu1 %1372  ;;  %v1423_v62 = vpop.permute.xlu0 %1422 }
 0x2b0   : > { %v1509_v12 = vsel %vm1497_vm0, %v1492_v18, %v1373_v60  ;;  %v1562_v35 = vsel %vm1548_vm3, %v1545_v8, %v1423_v62 }
 0x2b1   : > { %v1526_v37 = vsel %vm1514_vm1, %v1509_v12, %v1389_v31 }
 0x2b2   : > { %v1543_v59 = vsel %vm1531_vm2, %v1526_v37, %v2861_v15  ;;  %v1905_v15 = vld [vmem:[%s3011_s5] ss:$0 sm:$0xff] }
 0x2b3   : > { %v1425_v2 = vpop.permute.xlu1 %1424  ;;  %v1560_v13 = vsel %vm1548_vm3, %v1543_v59, %v1421_v3 }
 0x2b4   : > { %v1564_v53 = vsel %vm1548_vm3, %v1547_v23, %v1425_v2  ;;  %v1894_v31 = vcombine.low %v1558_v6, %v1560_v13 }
 0x2b5   : > { %v1895_v30 = vcombine.low %v1562_v35, %v1564_v53 }
 0x2b6   : > { %1964 = vmatprep.mubr.msk.bf16.mxu1 %vm1621_vm4, %v1894_v31 }
 0x2b7   : > { %1965 = vmatmul.mubr.msk.bf16.gmra.mrb[4].mxu1 %vm1621_vm4, %v1895_v30 }
 0x372   : > { %v1962_v5 = vpop.f32.mrb[0].mxu1 }
 0x373   : > { %v1672_v50 = vpop.f32.mrb[1].mxu1  ;;  %v1712_v55 = vmul.f32 %v1962_v5, %v1905_v15 }
 0x374   : > { %v1710_v58 = vmul.f32 %v1905_v15, %v1672_v50  ;;  %v1963_v7 = vpop.f32.mrb[2].mxu1 }
 0x375   : > { %v1675_v3 = vpop.f32.mrb[3].mxu1  ;;  %v1727_v38 = vadd.f32 %v1906_v39, %v1712_v55  ;;  %v1713_v46 = vmul.f32 %v1963_v7, %v1905_v15 }
 0x376   : > { %v1725_v54 = vadd.f32 %v1906_v39, %v1710_v58  ;;  %v1711_v16 = vmul.f32 %v1905_v15, %v1675_v3 }
 0x377   : > { %v1735_v25 = vmul.f32 0.01, %v1727_v38  ;;  %v1728_v49 = vadd.f32 %v1906_v39, %v1713_v46 }
 0x378   : > { %v1733_v9 = vmul.f32 0.01, %v1725_v54  ;;  %v1726_v47 = vadd.f32 %v1906_v39, %v1711_v16 }
 0x379   : > { %v1736_v11 = vmul.f32 0.01, %v1728_v49  ;;  %v1743_v41 = vmax.f32 %v1727_v38, %v1735_v25 }
 0x37a   : > { %v1734_v33 = vmul.f32 0.01, %v1726_v47  ;;  %v1741_v14 = vmax.f32 %v1725_v54, %v1733_v9 }
 0x37b   : > { %v1744_v45 = vmax.f32 %v1728_v49, %v1736_v11 }
 0x37c   : > { %1749 = vxpose.xlu0.b32.start [1/8] (short) (narrow) %v1741_v14, 8  ;;  %v1742_v17 = vmax.f32 %v1726_v47, %v1734_v33 }
 0x380   : > { %1750 = vxpose.xlu0.b32.cont [2/8] (short) (narrow) %v1742_v17, 8 }
 0x384   : > { %1751 = vxpose.xlu0.b32.cont [3/8] (short) (narrow) %v1743_v41, 8 }
 0x388   : > { %1752 = vxpose.xlu0.b32.cont [4/8] (short) (narrow) %v1744_v45, 8 }
 0x38a   : > { %v1966_v26 = vpop.f32.mrb[4].mxu1 }
 0x38b   : > { %v1688_v36 = vpop.f32.mrb[5].mxu1  ;;  %v1716_v20 = vmul.f32 %v1966_v26, %v1905_v15 }
 0x38c   : > { %v1714_v43 = vmul.f32 %v1905_v15, %v1688_v36  ;;  %v1967_v34 = vpop.f32.mrb[6].mxu1 }
 0x38d   : > { %v1691_v28 = vpop.f32.mrb[7].mxu1  ;;  %v1731_v1 = vadd.f32 %v1906_v39, %v1716_v20  ;;  %v1717_v21 = vmul.f32 %v1967_v34, %v1905_v15 }
 0x38e   : > { %v1729_v51 = vadd.f32 %v1906_v39, %v1714_v43  ;;  %v1715_v61 = vmul.f32 %v1905_v15, %v1691_v28 }
 0x38f   : > { %v1739_v22 = vmul.f32 0.01, %v1731_v1  ;;  %v1732_v4 = vadd.f32 %v1906_v39, %v1717_v21 }
 0x390   : > { %v1737_v52 = vmul.f32 0.01, %v1729_v51  ;;  %v1730_v10 = vadd.f32 %v1906_v39, %v1715_v61 }
 0x391   : > { %v1740_v57 = vmul.f32 0.01, %v1732_v4  ;;  %v1747_v32 = vmax.f32 %v1731_v1, %v1739_v22 }
 0x392   : > { %v1738_v0 = vmul.f32 0.01, %v1730_v10  ;;  %v1745_v24 = vmax.f32 %v1729_v51, %v1737_v52 }
 0x393   : > { %v1748_v27 = vmax.f32 %v1732_v4, %v1740_v57 }
 0x394   : > { %1753 = vxpose.xlu0.b32.cont [5/8] (short) (narrow) %v1745_v24, 8  ;;  %v1746_v56 = vmax.f32 %v1730_v10, %v1738_v0 }
 0x398   : > { %1754 = vxpose.xlu0.b32.cont [6/8] (short) (narrow) %v1746_v56, 8 }
 0x39c   : > { %1755 = vxpose.xlu0.b32.cont [7/8] (short) (narrow) %v1747_v32, 8 }
 0x3a0   : > { %1756 = vxpose.xlu0.b32.end [8/8] (short) (narrow) %v1748_v27, 8 }
 0x404   : > { %v1765_v29 = vpop.trf.xlu0 }
 0x405   : > { %1781 = vst.msk [vmem:[%s271_s16] sm:$0xff] %vm1548_vm3, %v1765_v29 }
 0x406   : > { %2044 = shalt.err (!%p2041_p3)
}
 0x407   : > { %s2045_s23 = scalar_lea.hbm %s2963_s18, 128  ;;  %s2049_s19 = scalar_lea.hbm %s3013_s7, 256 }
 0x408   : > { %p2046_p4 = scmp.ne.s32.totalorder %s2963_s18, %s2045_s23  ;;  %p2050_p9 = scmp.lt.u32.totalorder %s2963_s18, %s3013_s7 }
 0x409   : > { %p2051_p10 = scmp.lt.u32.totalorder %s2049_s19, %s2045_s23  ;;  %p2053_p12 = scmp.lt.u32.totalorder %s2045_s23, %s2963_s18 }
 0x40a   : > { %p2047_p7 = pnand %p2046_p4, %p2187_p5 }
 0x40b   : > { %p2052_p11 = por %p2051_p10, %p2050_p9 }
 0x40c   : > { %p2048_p8 = pneg %p2047_p7 }
 0x40d   : > { %p2054_p13 = por %p2053_p12, %p2052_p11 }
 0x40f   : > { %p2055_p0 = pnand %p2054_p13, %p2048_p8 }
 0x411   : > { %2058 = shalt.err (!%p2055_p0)
}
 0x412   : > { %1970 = dma.vmem_to_hbm [thread:$0]  (%p2187_p5), %s2965_s8, 128, %s2963_s18, %s1783_s20  }
 0x413 PF: > { %p1976_p1 = scmp.ge.s32.totalorder %s2093_s27, 2  ;;  %s1808_s9 = sand.u32 1, %s2081_s24  }
 0x414   : > { %s1809_s17 = scalar_lea.sflag [#allocation3], %s1808_s9 }
 0x415   : > { %p1973_p2 = pnand %p1976_p1, %p2191_p6 }
 0x417   : > { %2076 = dma.done.wait (!%p1973_p2), %s1809_s17, 128  }
 0x418   : > { %2078 = vsyncadd (!%p1973_p2), %s1809_s17, 4294967168  ;;  %p17_p3 = scmp.ge.s32.totalorder %s2174_s30, 4   ;;  %s3020_s24 = smov %s2085_s25 }
 0x419   : > { %s3021_s25 = smov %s2089_s26  ;;  %s3022_s26 = smov %s2185_s10 }
 0x41a   : > { %s3023_s27 = smov %s2174_s30  ;;  %19 = sbr.rel (!%p17_p3) target bundleno = 3 (0x3), region = 83 }
 0x421   :  { %1814 = vsyncpa [#allocation3], 1 }
 0x422   :  { %1816 = vsyncpa [#allocation3 + $0x1], 1 }

</bundles_post_ra>
